<compile_context>
chip_gen: v6e
topology: v6e:2x2x1
jax: 0.10.0
libtpu: 0.0.40
codegen_flags: <defaults>
</compile_context>

<pallas_src>
import jax
import jax.numpy as jnp
from jax.experimental import pallas as pl
from jax.experimental.pallas import tpu as pltpu

IN_F = 9     # board features
H1 = 128     # fc1 width
H2 = 64      # fc2 width (true, un-padded)


def _critic_kernel(x_ref, w1_ref, b1_ref, w2_ref, b2_ref, w3_ref, b3_ref, o_ref):
    # x_ref:  (9, TB)     feature-major input tile (batch on lanes)
    # w1_ref: (128, 9)    fc1 weight (out, in)
    # b1_ref: (128, 1)
    # w2_ref: (64, 128)   fc2 weight (out, in)
    # b2_ref: (64, 1)
    # w3_ref: (64, 1)     fc3 weight
    # b3_ref: (1, 1)
    # o_ref:  (1, TB)
    x = x_ref[...]
    w1 = w1_ref[...]
    tb = x.shape[1]

    # fc1: K=9 contraction as a VPU broadcast-MAC (MXU would be ~97% empty).
    acc = jnp.broadcast_to(b1_ref[...], (H1, tb))
    for k in range(IN_F):                        # static 9-way unroll
        acc = acc + w1[:, k:k + 1] * x[k:k + 1, :]
    h1 = jnp.maximum(acc, 0.0)                   # (128, TB)

    # fc2: the only dense contraction -> MXU, lane axis fully 128-dense.
    h2 = jnp.dot(w2_ref[...], h1, preferred_element_type=jnp.float32)
    h2 = jnp.maximum(h2 + b2_ref[...], 0.0)      # (64, TB)

    # fc3: N=1 -> elementwise multiply + sublane (XLU) reduction instead of MXU.
    o_ref[...] = jnp.sum(h2 * w3_ref[...], axis=0, keepdims=True) + b3_ref[...]


def _round_up(n, m):
    return ((n + m - 1) // m) * m


def critic_forward(x, params, *, tb=512):
    """x: (B, 9) float32. params: w1 (9,128), b1 (1,128), w2 (128,64),
    b2 (1,64), w3 (64,1), b3 (1,1). Returns (B, 1) float32."""
    B = x.shape[0]

    # Lane-dense batch tile (multiple of 128), capped so tiny batches don't
    # over-pad; 512 lanes/step keeps the streamed x/out DMA near the HBM roofline.
    tb = max(128, min(tb, _round_up(B, 128)))
    bp = _round_up(B, tb)
    grid = (bp // tb,)

    # Feature-major input, zero-padded batch.
    xt = x.T                                                    # (9, B)
    if bp != B:
        xt = jnp.pad(xt, ((0, 0), (0, bp - B)))

    # Kernel-layout weights: (out, in).
    w1k = params["w1"].T                                        # (128, 9)
    b1k = params["b1"].T                                        # (128, 1)
    w2k = params["w2"].T                                        # (64, 128)
    b2k = params["b2"].T                                        # (64, 1)
    w3k = params["w3"]                                          # (64, 1)
    b3k = params["b3"]                                          # (1, 1)

    # Weights/biases stay VMEM-resident across the whole batch sweep
    # (constant index_map -> fetched once, never re-DMA'd).
    resident = lambda a: pl.BlockSpec(a.shape, lambda i: (0,) * a.ndim)

    out_t = pl.pallas_call(
        _critic_kernel,
        out_shape=jax.ShapeDtypeStruct((1, bp), jnp.float32),
        grid=grid,
        in_specs=[
            pl.BlockSpec((IN_F, tb), lambda i: (0, i)),         # x streamed over batch
            resident(w1k), resident(b1k),
            resident(w2k), resident(b2k),
            resident(w3k), resident(b3k),
        ],
        out_specs=pl.BlockSpec((1, tb), lambda i: (0, i)),      # lane-dense output
        compiler_params=pltpu.CompilerParams(
            dimension_semantics=("parallel",),                  # v7x: shard over 2 TCs
        ),
    )(xt, w1k, b1k, w2k, b2k, w3k, b3k)

    return out_t[:, :B].T                                       # (B, 1)


def init_params(key):
    """Deterministic init mimicking PyTorch nn.Linear default (uniform +/-1/sqrt(fan_in))."""
    dims = [(9, 128), (128, 64), (64, 1)]
    params = {}
    for i, (fan_in, fan_out) in enumerate(dims, start=1):
        key, kw, kb = jax.random.split(key, 3)
        bound = 1.0 / jnp.sqrt(float(fan_in))
        params[f"w{i}"] = jax.random.uniform(
            kw, (fan_in, fan_out), jnp.float32, minval=-bound, maxval=bound
        )
        params[f"b{i}"] = jax.random.uniform(
            kb, (1, fan_out), jnp.float32, minval=-bound, maxval=bound
        )
    return params


def _reference_forward(x, params):
    h1 = jnp.maximum(x @ params["w1"] + params["b1"], 0.0)
    h2 = jnp.maximum(h1 @ params["w2"] + params["b2"], 0.0)
    return h2 @ params["w3"] + params["b3"]


if __name__ == "__main__":
    key = jax.random.PRNGKey(0)
    key, kx = jax.random.split(key)

    # Board state for tic-tac-toe: 9 features per sample; small batch.
    # NOTE: at B=8 the call is launch-latency dominated; the kernel is shaped
    # for large batched evaluation (B in the thousands).
    B = 8
    x = jax.random.normal(kx, (B, 9), dtype=jnp.float32)

    params = init_params(key)

    out = critic_forward(x, params)
    out = jax.block_until_ready(out)

    ref = _reference_forward(x, params)
    assert out.shape == (B, 1)
    assert jnp.allclose(out, ref, atol=1e-4, rtol=1e-4), "Pallas output mismatch vs reference"

    print("KERNEL_OK")
</pallas_src>

<mosaic_0001>
module attributes {stable_mosaic.version = 11 : i64} {
  func.func @_critic_kernel(%arg0: i32, %arg1: memref<9x128xf32, #tpu.memory_space<vmem>>, %arg2: memref<128x9xf32, #tpu.memory_space<vmem>>, %arg3: memref<128x1xf32, #tpu.memory_space<vmem>>, %arg4: memref<64x128xf32, #tpu.memory_space<vmem>>, %arg5: memref<64x1xf32, #tpu.memory_space<vmem>>, %arg6: memref<64x1xf32, #tpu.memory_space<vmem>>, %arg7: memref<1x1xf32, #tpu.memory_space<vmem>>, %arg8: memref<1x128xf32, #tpu.memory_space<vmem>>) attributes {dimension_semantics = [#tpu.dimension_semantics<parallel>], iteration_bounds = array<i64: 1>, scalar_prefetch = 0 : i64, scratch_operands = 0 : i64, tpu.core_type = #tpu.core_type<tc>, window_params = [{transform_indices = @transform_0, window_bounds = array<i64: 9, 128>}, {pipeline_mode = #tpu.pipeline_mode<synchronous>, transform_indices = @transform_1, window_bounds = array<i64: 128, 9>}, {pipeline_mode = #tpu.pipeline_mode<synchronous>, transform_indices = @transform_2, window_bounds = array<i64: 128, 1>}, {pipeline_mode = #tpu.pipeline_mode<synchronous>, transform_indices = @transform_3, window_bounds = array<i64: 64, 128>}, {pipeline_mode = #tpu.pipeline_mode<synchronous>, transform_indices = @transform_4, window_bounds = array<i64: 64, 1>}, {pipeline_mode = #tpu.pipeline_mode<synchronous>, transform_indices = @transform_5, window_bounds = array<i64: 64, 1>}, {pipeline_mode = #tpu.pipeline_mode<synchronous>, transform_indices = @transform_6, window_bounds = array<i64: 1, 1>}, {transform_indices = @transform_7, window_bounds = array<i64: 1, 128>}]} {
    %c0 = arith.constant 0 : index
    %c0_0 = arith.constant 0 : index
    %0 = vector.load %arg1[%c0, %c0_0] : memref<9x128xf32, #tpu.memory_space<vmem>>, vector<9x128xf32>
    %c0_1 = arith.constant 0 : index
    %c0_2 = arith.constant 0 : index
    %1 = vector.load %arg2[%c0_1, %c0_2] : memref<128x9xf32, #tpu.memory_space<vmem>>, vector<128x9xf32>
    %c0_3 = arith.constant 0 : index
    %c0_4 = arith.constant 0 : index
    %2 = vector.load %arg3[%c0_3, %c0_4] : memref<128x1xf32, #tpu.memory_space<vmem>>, vector<128x1xf32>
    %3 = vector.shape_cast %2 : vector<128x1xf32> to vector<128x1xf32>
    %4 = vector.broadcast %3 : vector<128x1xf32> to vector<128x128xf32>
    %5 = vector.extract_strided_slice %1 {offsets = [0, 0], sizes = [128, 1], strides = [1, 1]} : vector<128x9xf32> to vector<128x1xf32>
    %6 = vector.extract_strided_slice %0 {offsets = [0, 0], sizes = [1, 128], strides = [1, 1]} : vector<9x128xf32> to vector<1x128xf32>
    %7 = vector.broadcast %5 : vector<128x1xf32> to vector<128x128xf32>
    %8 = vector.broadcast %6 : vector<1x128xf32> to vector<128x128xf32>
    %9 = arith.mulf %7, %8 : vector<128x128xf32>
    %10 = arith.addf %4, %9 : vector<128x128xf32>
    %11 = vector.extract_strided_slice %1 {offsets = [0, 1], sizes = [128, 1], strides = [1, 1]} : vector<128x9xf32> to vector<128x1xf32>
    %12 = vector.extract_strided_slice %0 {offsets = [1, 0], sizes = [1, 128], strides = [1, 1]} : vector<9x128xf32> to vector<1x128xf32>
    %13 = vector.broadcast %11 : vector<128x1xf32> to vector<128x128xf32>
    %14 = vector.broadcast %12 : vector<1x128xf32> to vector<128x128xf32>
    %15 = arith.mulf %13, %14 : vector<128x128xf32>
    %16 = arith.addf %10, %15 : vector<128x128xf32>
    %17 = vector.extract_strided_slice %1 {offsets = [0, 2], sizes = [128, 1], strides = [1, 1]} : vector<128x9xf32> to vector<128x1xf32>
    %18 = vector.extract_strided_slice %0 {offsets = [2, 0], sizes = [1, 128], strides = [1, 1]} : vector<9x128xf32> to vector<1x128xf32>
    %19 = vector.broadcast %17 : vector<128x1xf32> to vector<128x128xf32>
    %20 = vector.broadcast %18 : vector<1x128xf32> to vector<128x128xf32>
    %21 = arith.mulf %19, %20 : vector<128x128xf32>
    %22 = arith.addf %16, %21 : vector<128x128xf32>
    %23 = vector.extract_strided_slice %1 {offsets = [0, 3], sizes = [128, 1], strides = [1, 1]} : vector<128x9xf32> to vector<128x1xf32>
    %24 = vector.extract_strided_slice %0 {offsets = [3, 0], sizes = [1, 128], strides = [1, 1]} : vector<9x128xf32> to vector<1x128xf32>
    %25 = vector.broadcast %23 : vector<128x1xf32> to vector<128x128xf32>
    %26 = vector.broadcast %24 : vector<1x128xf32> to vector<128x128xf32>
    %27 = arith.mulf %25, %26 : vector<128x128xf32>
    %28 = arith.addf %22, %27 : vector<128x128xf32>
    %29 = vector.extract_strided_slice %1 {offsets = [0, 4], sizes = [128, 1], strides = [1, 1]} : vector<128x9xf32> to vector<128x1xf32>
    %30 = vector.extract_strided_slice %0 {offsets = [4, 0], sizes = [1, 128], strides = [1, 1]} : vector<9x128xf32> to vector<1x128xf32>
    %31 = vector.broadcast %29 : vector<128x1xf32> to vector<128x128xf32>
    %32 = vector.broadcast %30 : vector<1x128xf32> to vector<128x128xf32>
    %33 = arith.mulf %31, %32 : vector<128x128xf32>
    %34 = arith.addf %28, %33 : vector<128x128xf32>
    %35 = vector.extract_strided_slice %1 {offsets = [0, 5], sizes = [128, 1], strides = [1, 1]} : vector<128x9xf32> to vector<128x1xf32>
    %36 = vector.extract_strided_slice %0 {offsets = [5, 0], sizes = [1, 128], strides = [1, 1]} : vector<9x128xf32> to vector<1x128xf32>
    %37 = vector.broadcast %35 : vector<128x1xf32> to vector<128x128xf32>
    %38 = vector.broadcast %36 : vector<1x128xf32> to vector<128x128xf32>
    %39 = arith.mulf %37, %38 : vector<128x128xf32>
    %40 = arith.addf %34, %39 : vector<128x128xf32>
    %41 = vector.extract_strided_slice %1 {offsets = [0, 6], sizes = [128, 1], strides = [1, 1]} : vector<128x9xf32> to vector<128x1xf32>
    %42 = vector.extract_strided_slice %0 {offsets = [6, 0], sizes = [1, 128], strides = [1, 1]} : vector<9x128xf32> to vector<1x128xf32>
    %43 = vector.broadcast %41 : vector<128x1xf32> to vector<128x128xf32>
    %44 = vector.broadcast %42 : vector<1x128xf32> to vector<128x128xf32>
    %45 = arith.mulf %43, %44 : vector<128x128xf32>
    %46 = arith.addf %40, %45 : vector<128x128xf32>
    %47 = vector.extract_strided_slice %1 {offsets = [0, 7], sizes = [128, 1], strides = [1, 1]} : vector<128x9xf32> to vector<128x1xf32>
    %48 = vector.extract_strided_slice %0 {offsets = [7, 0], sizes = [1, 128], strides = [1, 1]} : vector<9x128xf32> to vector<1x128xf32>
    %49 = vector.broadcast %47 : vector<128x1xf32> to vector<128x128xf32>
    %50 = vector.broadcast %48 : vector<1x128xf32> to vector<128x128xf32>
    %51 = arith.mulf %49, %50 : vector<128x128xf32>
    %52 = arith.addf %46, %51 : vector<128x128xf32>
    %53 = vector.extract_strided_slice %1 {offsets = [0, 8], sizes = [128, 1], strides = [1, 1]} : vector<128x9xf32> to vector<128x1xf32>
    %54 = vector.extract_strided_slice %0 {offsets = [8, 0], sizes = [1, 128], strides = [1, 1]} : vector<9x128xf32> to vector<1x128xf32>
    %55 = vector.broadcast %53 : vector<128x1xf32> to vector<128x128xf32>
    %56 = vector.broadcast %54 : vector<1x128xf32> to vector<128x128xf32>
    %57 = arith.mulf %55, %56 : vector<128x128xf32>
    %58 = arith.addf %52, %57 : vector<128x128xf32>
    %cst = arith.constant 0.000000e+00 : f32
    %59 = vector.broadcast %cst : f32 to vector<128x128xf32>
    %60 = arith.maximumf %58, %59 : vector<128x128xf32>
    %c0_5 = arith.constant 0 : index
    %c0_6 = arith.constant 0 : index
    %61 = vector.load %arg4[%c0_5, %c0_6] : memref<64x128xf32, #tpu.memory_space<vmem>>, vector<64x128xf32>
    %cst_7 = arith.constant dense<0.000000e+00> : vector<64x128xf32>
    %62 = tpu.matmul %61, %60, %cst_7 {dimension_numbers = #tpu.dot_dimension_numbers<[1], [0], [0], [1], [0, 0, 1, 1], [], []>} : vector<64x128xf32>, vector<128x128xf32>, vector<64x128xf32> -> vector<64x128xf32>
    %c0_8 = arith.constant 0 : index
    %c0_9 = arith.constant 0 : index
    %63 = vector.load %arg5[%c0_8, %c0_9] : memref<64x1xf32, #tpu.memory_space<vmem>>, vector<64x1xf32>
    %64 = vector.broadcast %63 : vector<64x1xf32> to vector<64x128xf32>
    %65 = arith.addf %62, %64 : vector<64x128xf32>
    %cst_10 = arith.constant 0.000000e+00 : f32
    %66 = vector.broadcast %cst_10 : f32 to vector<64x128xf32>
    %67 = arith.maximumf %65, %66 : vector<64x128xf32>
    %c0_11 = arith.constant 0 : index
    %c0_12 = arith.constant 0 : index
    %68 = vector.load %arg6[%c0_11, %c0_12] : memref<64x1xf32, #tpu.memory_space<vmem>>, vector<64x1xf32>
    %69 = vector.broadcast %68 : vector<64x1xf32> to vector<64x128xf32>
    %70 = arith.mulf %67, %69 : vector<64x128xf32>
    %cst_13 = arith.constant dense<0.000000e+00> : vector<128xf32>
    %71 = vector.multi_reduction <add>, %70, %cst_13 [0] : vector<64x128xf32> to vector<128xf32>
    %72 = vector.shape_cast %71 : vector<128xf32> to vector<1x128xf32>
    %c0_14 = arith.constant 0 : index
    %c0_15 = arith.constant 0 : index
    %73 = vector.load %arg7[%c0_14, %c0_15] : memref<1x1xf32, #tpu.memory_space<vmem>>, vector<1x1xf32>
    %74 = vector.broadcast %73 : vector<1x1xf32> to vector<1x128xf32>
    %75 = arith.addf %72, %74 : vector<1x128xf32>
    %c0_16 = arith.constant 0 : index
    %c0_17 = arith.constant 0 : index
    %76 = vector.load %arg8[%c0_16, %c0_17] : memref<1x128xf32, #tpu.memory_space<vmem>>, vector<1x128xf32>
    tpu.vector_store %arg8[%c0_16, %c0_17], %75 {strides = array<i32>} : memref<1x128xf32, #tpu.memory_space<vmem>>, vector<1x128xf32>,
    return
  }
  func.func @transform_0(%arg0: i32) -> (i32, i32) {
    %c0_i32 = arith.constant 0 : i32
    %c0_i32_0 = arith.constant 0 : i32
    return %c0_i32, %arg0 : i32, i32
  }
  func.func @transform_1(%arg0: i32) -> (i32, i32) {
    %c0_i32 = arith.constant 0 : i32
    %c0_i32_0 = arith.constant 0 : i32
    %c0_i32_1 = arith.constant 0 : i32
    return %c0_i32, %c0_i32_0 : i32, i32
  }
  func.func @transform_2(%arg0: i32) -> (i32, i32) {
    %c0_i32 = arith.constant 0 : i32
    %c0_i32_0 = arith.constant 0 : i32
    %c0_i32_1 = arith.constant 0 : i32
    return %c0_i32, %c0_i32_0 : i32, i32
  }
  func.func @transform_3(%arg0: i32) -> (i32, i32) {
    %c0_i32 = arith.constant 0 : i32
    %c0_i32_0 = arith.constant 0 : i32
    %c0_i32_1 = arith.constant 0 : i32
    return %c0_i32, %c0_i32_0 : i32, i32
  }
  func.func @transform_4(%arg0: i32) -> (i32, i32) {
    %c0_i32 = arith.constant 0 : i32
    %c0_i32_0 = arith.constant 0 : i32
    %c0_i32_1 = arith.constant 0 : i32
    return %c0_i32, %c0_i32_0 : i32, i32
  }
  func.func @transform_5(%arg0: i32) -> (i32, i32) {
    %c0_i32 = arith.constant 0 : i32
    %c0_i32_0 = arith.constant 0 : i32
    %c0_i32_1 = arith.constant 0 : i32
    return %c0_i32, %c0_i32_0 : i32, i32
  }
  func.func @transform_6(%arg0: i32) -> (i32, i32) {
    %c0_i32 = arith.constant 0 : i32
    %c0_i32_0 = arith.constant 0 : i32
    %c0_i32_1 = arith.constant 0 : i32
    return %c0_i32, %c0_i32_0 : i32, i32
  }
  func.func @transform_7(%arg0: i32) -> (i32, i32) {
    %c0_i32 = arith.constant 0 : i32
    %c0_i32_0 = arith.constant 0 : i32
    return %c0_i32, %arg0 : i32, i32
  }
}

</mosaic_0001>

<bundles_post_ra>
// kernel: tpu_custom_call.1
= control target key start
LH: loop header
LB: loop body
LE: loop exit
PB: predicated region body
PF: predicated region fallthrough
CT: control target
= control target key end

     0   :  { %s2459_s0 = inlined_call_operand.vmem [shape: f32[9,128], index: 0, kind: input, shape index: {}]   ;;  %s2460_s1 = inlined_call_operand.vmem [shape: f32[128,9], index: 1, kind: input, shape index: {}]   ;;  %s2461_s2 = inlined_call_operand.vmem [shape: f32[128,1], index: 2, kind: input, shape index: {}]   ;;  %s2462_s3 = inlined_call_operand.vmem [shape: f32[64,128], index: 3, kind: input, shape index: {}]   ;;  %s2463_s4 = inlined_call_operand.vmem [shape: f32[64,1], index: 4, kind: input, shape index: {}]   ;;  %s2464_s5 = inlined_call_operand.vmem [shape: f32[64,1], index: 5, kind: input, shape index: {}]   ;;  %s2465_s6 = inlined_call_operand.<no memory space> [shape: f32[1,1], index: 6, kind: input, shape index: {}]   ;;  %s2466_s7 = inlined_call_operand.hbm [shape: f32[1,128], index: 7, kind: output, shape index: {}]  }
   0x1   :  { %v12_v0 = vstv %s2465_s6 }
   0x2   :  { %13 = vst [vmem:[#allocation2] sm:$0x1] %v12_v0 }
   0x3   :  { %v49_v1 = vld [vmem:[%s2461_s2 + $0x10] sm:$0xff]  ;;  %v47_v2 = vld [vmem:[%s2461_s2] sm:$0xff]  ;;  %v2468_v3 = vmov 0   ;;  %v50_v4 = vld [vmem:[%s2461_s2 + $0x18] sm:$0xff] }
   0x4   :  { %1451 = vset.pattern.permute.xlu1 %v2468_v3  ;;  %1450 = vset.pattern.permute.xlu0 %v2468_v3  ;;  %v48_v5 = vld [vmem:[%s2461_s2 + $0x8] sm:$0xff]  ;;  %v51_v7 = vld [vmem:[%s2461_s2 + $0x20] sm:$0xff] }
   0x5   :  { %75 = vperm.xlu1 %1451, %v49_v1   ;;  %65 = vperm.xlu0 %1450, %v47_v2   ;;  %v52_v6 = vld [vmem:[%s2461_s2 + $0x28] sm:$0xff] }
   0x9   :  { %80 = vperm.xlu1 %1451, %v50_v4   ;;  %70 = vperm.xlu0 %1450, %v48_v5  }
   0xd   :  { %90 = vperm.xlu1 %1451, %v52_v6   ;;  %85 = vperm.xlu0 %1450, %v51_v7  }
   0xe   :  { %14 = vsyncpa [#allocation4], 0  ;;  %v54_v8 = vld [vmem:[%s2461_s2 + $0x38] sm:$0xff]  ;;  %v53_v9 = vld [vmem:[%s2461_s2 + $0x30] sm:$0xff]  ;;  %v1535_v34 = vmov 1   ;;  %v1536_v35 = vmov 2   ;;  %v223_v62 = vlaneseq }
   0xf   :  { %v56_v10 = vld [vmem:[%s2461_s2 + $0x48] sm:$0xff]  ;;  %v55_v11 = vld [vmem:[%s2461_s2 + $0x40] sm:$0xff]  ;;  %v58_v12 = vld [vmem:[%s2461_s2 + $0x58] sm:$0xff]  ;;  %v1537_v38 = vmov 3   ;;  %v1538_v56 = vmov 4  }
  0x10   :  { %v57_v13 = vld [vmem:[%s2461_s2 + $0x50] sm:$0xff]  ;;  %v60_v14 = vld [vmem:[%s2461_s2 + $0x68] sm:$0xff]  ;;  %v59_v15 = vld [vmem:[%s2461_s2 + $0x60] sm:$0xff]  ;;  %v1825_v1 = vshrl.u32 %v223_v62, 7 }
  0x11   :  { %100 = vperm.xlu1 %1451, %v54_v8   ;;  %95 = vperm.xlu0 %1450, %v53_v9   ;;  %v62_v16 = vld [vmem:[%s2461_s2 + $0x78] sm:$0xff]  ;;  %v61_v17 = vld [vmem:[%s2461_s2 + $0x70] sm:$0xff]  ;;  %v1640_v18 = vld [vmem:[%s2460_s1 + $0x8] sm:$0xff] }
  0x12   :  { %v1645_v19 = vld [vmem:[%s2460_s1] sm:$0xff]  ;;  %v1652_v20 = vld [vmem:[%s2460_s1 + $0x18] sm:$0xff]  ;;  %v1657_v21 = vld [vmem:[%s2460_s1 + $0x10] sm:$0xff]  ;;  %v2467_v5 = vsub.s32 0, %v1825_v1 }
  0x13   :  { %v1664_v22 = vld [vmem:[%s2460_s1 + $0x28] sm:$0xff]  ;;  %v1669_v23 = vld [vmem:[%s2460_s1 + $0x20] sm:$0xff]  ;;  %v1676_v24 = vld [vmem:[%s2460_s1 + $0x38] sm:$0xff] }
  0x14   :  { %v1681_v25 = vld [vmem:[%s2460_s1 + $0x30] sm:$0xff]  ;;  %v1688_v26 = vld [vmem:[%s2460_s1 + $0x48] sm:$0xff]  ;;  %v1693_v27 = vld [vmem:[%s2460_s1 + $0x40] sm:$0xff] }
  0x15   :  { %110 = vperm.xlu1 %1451, %v56_v10   ;;  %105 = vperm.xlu0 %1450, %v55_v11   ;;  %v1700_v28 = vld [vmem:[%s2460_s1 + $0x58] sm:$0xff]  ;;  %v1705_v29 = vld [vmem:[%s2460_s1 + $0x50] sm:$0xff]  ;;  %v1712_v30 = vld [vmem:[%s2460_s1 + $0x68] sm:$0xff]  ;;  %v325_v10 = vsub.s32 1, %v1825_v1 }
  0x16   :  { %v1717_v31 = vld [vmem:[%s2460_s1 + $0x60] sm:$0xff]  ;;  %v1724_v32 = vld [vmem:[%s2460_s1 + $0x78] sm:$0xff]  ;;  %v1729_v33 = vld [vmem:[%s2460_s1 + $0x70] sm:$0xff] }
  0x17   :  { %v1837_v6 = vld [vmem:[%s2459_s0] sm:$0xff] }
  0x18   :  { %v1848_v9 = vrot.slane %v1837_v6, %v2467_v5 }
  0x19   :  { %120 = vperm.xlu1 %1451, %v58_v12   ;;  %115 = vperm.xlu0 %1450, %v57_v13  }
  0x1d   :  { %130 = vperm.xlu1 %1451, %v60_v14   ;;  %125 = vperm.xlu0 %1450, %v59_v15   ;;  %v2470_v14 = vmov 8  }
  0x21   :  { %140 = vperm.xlu1 %1451, %v62_v16   ;;  %135 = vperm.xlu0 %1450, %v61_v17   ;;  %v1861_v16 = vrot.slane %v1837_v6, %v325_v10 }
  0x25   :  { %150 = vperm.xlu1 %1451, %v1640_v18   ;;  %145 = vperm.xlu0 %1450, %v1645_v19  }
  0x29   :  { %160 = vperm.xlu1 %1451, %v1652_v20   ;;  %155 = vperm.xlu0 %1450, %v1657_v21  }
  0x2d   :  { %170 = vperm.xlu1 %1451, %v1664_v22   ;;  %165 = vperm.xlu0 %1450, %v1669_v23  }
  0x31   :  { %180 = vperm.xlu1 %1451, %v1676_v24   ;;  %175 = vperm.xlu0 %1450, %v1681_v25  }
  0x35   :  { %190 = vperm.xlu1 %1451, %v1688_v26   ;;  %185 = vperm.xlu0 %1450, %v1693_v27  }
  0x39   :  { %200 = vperm.xlu1 %1451, %v1700_v28   ;;  %195 = vperm.xlu0 %1450, %v1705_v29  }
  0x3d   :  { %210 = vperm.xlu1 %1451, %v1712_v30   ;;  %205 = vperm.xlu0 %1450, %v1717_v31  }
  0x41   :  { %220 = vperm.xlu1 %1451, %v1724_v32   ;;  %215 = vperm.xlu0 %1450, %v1729_v33  }
  0x45   :  { %1453 = vset.pattern.permute.xlu1 %v1535_v34  ;;  %1452 = vset.pattern.permute.xlu0 %v1535_v34 }
  0x46   :  { %264 = vperm.xlu1 %1453, %v1640_v18   ;;  %260 = vperm.xlu0 %1452, %v1645_v19  }
  0x4a   :  { %268 = vperm.xlu1 %1453, %v1657_v21   ;;  %272 = vperm.xlu0 %1452, %v1652_v20  }
  0x4e   :  { %276 = vperm.xlu1 %1453, %v1669_v23   ;;  %280 = vperm.xlu0 %1452, %v1664_v22  }
  0x52   :  { %284 = vperm.xlu1 %1453, %v1681_v25   ;;  %288 = vperm.xlu0 %1452, %v1676_v24  }
  0x56   :  { %292 = vperm.xlu1 %1453, %v1693_v27   ;;  %296 = vperm.xlu0 %1452, %v1688_v26  }
  0x5a   :  { %300 = vperm.xlu1 %1453, %v1705_v29   ;;  %304 = vperm.xlu0 %1452, %v1700_v28  }
  0x5e   :  { %308 = vperm.xlu1 %1453, %v1717_v31   ;;  %312 = vperm.xlu0 %1452, %v1712_v30  }
  0x62   :  { %316 = vperm.xlu1 %1453, %v1729_v33   ;;  %320 = vperm.xlu0 %1452, %v1724_v32  }
  0x66   :  { %1454 = vset.pattern.permute.xlu1 %v1536_v35  ;;  %1455 = vset.pattern.permute.xlu0 %v1536_v35 }
  0x67   :  { %360 = vperm.xlu1 %1454, %v1645_v19   ;;  %364 = vperm.xlu0 %1455, %v1640_v18  }
  0x6b   :  { %368 = vperm.xlu1 %1454, %v1657_v21   ;;  %376 = vperm.xlu0 %1455, %v1669_v23  }
  0x6f   :  { %372 = vperm.xlu1 %1454, %v1652_v20   ;;  %384 = vperm.xlu0 %1455, %v1681_v25  }
  0x73   :  { %380 = vperm.xlu1 %1454, %v1664_v22   ;;  %392 = vperm.xlu0 %1455, %v1693_v27  }
  0x77   :  { %388 = vperm.xlu1 %1454, %v1676_v24   ;;  %400 = vperm.xlu0 %1455, %v1705_v29  }
  0x7b   :  { %396 = vperm.xlu1 %1454, %v1688_v26   ;;  %408 = vperm.xlu0 %1455, %v1717_v31  }
  0x7f   :  { %404 = vperm.xlu1 %1454, %v1700_v28   ;;  %416 = vperm.xlu0 %1455, %v1729_v33  }
  0x80   :  { %v1763_v36 = vpop.permute.xlu1 %75  ;;  %v1765_v37 = vpop.permute.xlu0 %65 }
  0x83   :  { %412 = vperm.xlu1 %1454, %v1712_v30   ;;  %1456 = vset.pattern.permute.xlu0 %v1537_v38 }
  0x84   :  { %v1768_v39 = vpop.permute.xlu1 %80  ;;  %v1770_v40 = vpop.permute.xlu0 %70  ;;  %460 = vperm.xlu0 %1456, %v1645_v19  }
  0x87   :  { %420 = vperm.xlu1 %1454, %v1724_v32  }
  0x88   :  { %v1774_v41 = vpop.permute.xlu1 %90  ;;  %v1776_v42 = vpop.permute.xlu0 %85  ;;  %472 = vperm.xlu0 %1456, %v1652_v20  }
  0x8b   :  { %1457 = vset.pattern.permute.xlu1 %v1537_v38 }
  0x8c   :  { %v1779_v43 = vpop.permute.xlu1 %100  ;;  %v1781_v44 = vpop.permute.xlu0 %95  ;;  %464 = vperm.xlu1 %1457, %v1640_v18   ;;  %480 = vperm.xlu0 %1456, %v1664_v22  }
  0x90   :  { %v1785_v45 = vpop.permute.xlu1 %110  ;;  %v1787_v46 = vpop.permute.xlu0 %105  ;;  %468 = vperm.xlu1 %1457, %v1657_v21   ;;  %488 = vperm.xlu0 %1456, %v1676_v24  }
  0x91   :  { %2478 = vst [vmem:[#allocation6_spill] sm:$0xff] %v1785_v45 }
  0x94   :  { %v1791_v47 = vpop.permute.xlu1 %120  ;;  %v1793_v48 = vpop.permute.xlu0 %115  ;;  %476 = vperm.xlu1 %1457, %v1669_v23   ;;  %496 = vperm.xlu0 %1456, %v1688_v26  }
  0x95   :  { %2479 = vst [vmem:[#allocation7_spill] sm:$0xff] %v1791_v47 }
  0x98   :  { %v1797_v49 = vpop.permute.xlu1 %130  ;;  %v1799_v50 = vpop.permute.xlu0 %125  ;;  %484 = vperm.xlu1 %1457, %v1681_v25   ;;  %504 = vperm.xlu0 %1456, %v1700_v28  }
  0x9c   :  { %v1803_v51 = vpop.permute.xlu1 %140  ;;  %v1805_v52 = vpop.permute.xlu0 %135  ;;  %492 = vperm.xlu1 %1457, %v1693_v27   ;;  %512 = vperm.xlu0 %1456, %v1712_v30  }
  0xa0   :  { %v151_v53 = vpop.permute.xlu1 %150  ;;  %500 = vperm.xlu1 %1457, %v1705_v29   ;;  %520 = vperm.xlu0 %1456, %v1724_v32   ;;  %v146_v54 = vpop.permute.xlu0 %145 }
  0xa1   :  { %v227_v11 = vmul.f32 %v1848_v9, %v146_v54  ;;  %v228_v15 = vmul.f32 %v1848_v9, %v151_v53 }
  0xa3   :  { %v243_v17 = vadd.f32 %v227_v11, %v1765_v37  ;;  %v244_v54 = vadd.f32 %v228_v15, %v1770_v40 }
  0xa4   :  { %v161_v55 = vpop.permute.xlu1 %160  ;;  %508 = vperm.xlu1 %1457, %v1717_v31   ;;  %1459 = vset.pattern.permute.xlu0 %v1538_v56  ;;  %v156_v57 = vpop.permute.xlu0 %155 }
  0xa5   :  { %564 = vperm.xlu0 %1459, %v1640_v18   ;;  %v230_v34 = vmul.f32 %v1848_v9, %v161_v55  ;;  %v229_v62 = vmul.f32 %v1848_v9, %v156_v57 }
  0xa7   :  { %v246_v55 = vadd.f32 %v230_v34, %v1768_v39  ;;  %v245_v57 = vadd.f32 %v229_v62, %v1763_v36 }
  0xa8   :  { %v171_v58 = vpop.permute.xlu1 %170  ;;  %516 = vperm.xlu1 %1457, %v1729_v33   ;;  %v166_v59 = vpop.permute.xlu0 %165 }
  0xa9   :  { %576 = vperm.xlu0 %1459, %v1669_v23   ;;  %v231_v10 = vmul.f32 %v1848_v9, %v166_v59  ;;  %v232_v15 = vmul.f32 %v1848_v9, %v171_v58 }
  0xab   :  { %v247_v59 = vadd.f32 %v231_v10, %v1776_v42  ;;  %v248_v34 = vadd.f32 %v232_v15, %v1774_v41 }
  0xac   :  { %v1816_v60 = vpop.permute.xlu1 %180  ;;  %1458 = vset.pattern.permute.xlu1 %v1538_v56  ;;  %v176_v61 = vpop.permute.xlu0 %175 }
  0xad   :  { %560 = vperm.xlu1 %1458, %v1645_v19   ;;  %584 = vperm.xlu0 %1459, %v1681_v25   ;;  %v233_v39 = vmul.f32 %v1848_v9, %v176_v61 }
  0xaf   :  { %v249_v42 = vadd.f32 %v233_v39, %v1781_v44 }
  0xb0   :  { %v1821_v63 = vpop.permute.xlu1 %190  ;;  %v186_v0 = vpop.permute.xlu0 %185 }
  0xb1   :  { %2480 = vst [vmem:[#allocation8_spill] sm:$0xff] %v1821_v63  ;;  %568 = vperm.xlu1 %1458, %v1657_v21   ;;  %592 = vperm.xlu0 %1459, %v1693_v27   ;;  %v235_v61 = vmul.f32 %v1848_v9, %v186_v0 }
  0xb3   :  { %v251_v15 = vadd.f32 %v235_v61, %v1787_v46  ;;  %v2472_v46 = vmov 6  }
  0xb4   :  { %v1827_v2 = vpop.permute.xlu1 %200  ;;  %v1829_v4 = vpop.permute.xlu0 %195 }
  0xb5   :  { %2481 = vst [vmem:[#allocation9_spill] sm:$0xff] %v1827_v2  ;;  %572 = vperm.xlu1 %1458, %v1652_v20   ;;  %600 = vperm.xlu0 %1459, %v1705_v29  }
  0xb8   :  { %v1839_v7 = vpop.permute.xlu1 %210  ;;  %v1841_v8 = vpop.permute.xlu0 %205 }
  0xb9   :  { %580 = vperm.xlu1 %1458, %v1664_v22   ;;  %620 = vperm.xlu0 %1459, %v1724_v32  }
  0xbc   :  { %v1852_v12 = vpop.permute.xlu1 %220  ;;  %v1854_v13 = vpop.permute.xlu0 %215 }
  0xbd   :  { %588 = vperm.xlu1 %1458, %v1676_v24   ;;  %1466 = vset.pattern.permute.xlu0 %v2470_v14  ;;  %v2476_v14 = vmov 7  }
  0xbe   :  { %1020 = vperm.xlu0 %1466, %v1724_v32  }
  0xc1   :  { %v265_v35 = vpop.permute.xlu1 %264  ;;  %596 = vperm.xlu1 %1458, %v1688_v26   ;;  %v261_v38 = vpop.permute.xlu0 %260 }
  0xc2   :  { %v328_v5 = vmul.f32 %v1861_v16, %v265_v35  ;;  %v327_v53 = vmul.f32 %v1861_v16, %v261_v38  ;;  %1008 = vperm.xlu0 %1466, %v1717_v31  }
  0xc4   :  { %v1872_v3 = vadd.f32 %v328_v5, %v244_v54  ;;  %v1874_v37 = vadd.f32 %v327_v53, %v243_v17  ;;  %v234_v54 = vmul.f32 %v1848_v9, %v1816_v60 }
  0xc5   :  { %v269_v11 = vpop.permute.xlu1 %268  ;;  %604 = vperm.xlu1 %1458, %v1700_v28   ;;  %v273_v40 = vpop.permute.xlu0 %272 }
  0xc6   :  { %v329_v35 = vmul.f32 %v1861_v16, %v269_v11  ;;  %v330_v38 = vmul.f32 %v1861_v16, %v273_v40  ;;  %1475 = vset.pattern.permute.xlu0 %v2476_v14  ;;  %v250_v40 = vadd.f32 %v234_v54, %v1779_v43 }
  0xc7   :  { %912 = vperm.xlu0 %1475, %v1712_v30  }
  0xc8   :  { %v1886_v5 = vadd.f32 %v329_v35, %v245_v57  ;;  %v1888_v17 = vadd.f32 %v330_v38, %v246_v55  ;;  %v2474_v38 = vmov 5  }
  0xc9   :  { %v277_v36 = vpop.permute.xlu1 %276  ;;  %616 = vperm.xlu1 %1458, %v1729_v33   ;;  %v281_v58 = vpop.permute.xlu0 %280 }
  0xca   :  { %v331_v62 = vmul.f32 %v1861_v16, %v277_v36  ;;  %v332_v53 = vmul.f32 %v1861_v16, %v281_v58 }
  0xcb   :  { %900 = vperm.xlu0 %1475, %v1705_v29  }
  0xcc   :  { %v347_v10 = vadd.f32 %v331_v62, %v247_v59  ;;  %v1899_v55 = vadd.f32 %v332_v53, %v248_v34  ;;  %v425_v62 = vsub.s32 2, %v1825_v1 }
  0xcd   :  { %v285_v11 = vpop.permute.xlu1 %284  ;;  %612 = vperm.xlu1 %1458, %v1712_v30   ;;  %v289_v41 = vpop.permute.xlu0 %288 }
  0xce   :  { %v333_v60 = vmul.f32 %v1861_v16, %v285_v11  ;;  %v334_v57 = vmul.f32 %v1861_v16, %v289_v41 }
  0xcf   :  { %888 = vperm.xlu0 %1475, %v1676_v24  }
  0xd0   :  { %v349_v44 = vadd.f32 %v333_v60, %v249_v42  ;;  %v1907_v35 = vadd.f32 %v334_v57, %v250_v40  ;;  %v1936_v42 = vrot.slane %v1837_v6, %v425_v62 }
  0xd1   :  { %v293_v0 = vpop.permute.xlu1 %292  ;;  %1460 = vset.pattern.permute.xlu1 %v2474_v38  ;;  %v1910_v59 = vpop.permute.xlu0 %296 }
  0xd2   :  { %2482 = vst [vmem:[#allocation10_spill] sm:$0xff] %v1910_v59  ;;  %v335_v39 = vmul.f32 %v1861_v16, %v293_v0  ;;  %716 = vperm.xlu1 %1460, %v1729_v33  }
  0xd3   :  { %876 = vperm.xlu0 %1475, %v1669_v23  }
  0xd4   :  { %v351_v43 = vadd.f32 %v335_v39, %v251_v15 }
  0xd5   :  { %v1915_v36 = vpop.permute.xlu1 %300  ;;  %v1917_v58 = vpop.permute.xlu0 %304 }
  0xd6   :  { %2483 = vst [vmem:[#allocation11_spill] sm:$0xff] %v1917_v58  ;;  %1461 = vset.pattern.permute.xlu1 %v1538_v56 }
  0xd7   :  { %608 = vperm.xlu1 %1461, %v1717_v31   ;;  %1494 = vset.pattern.permute.xlu0 %v2472_v46 }
  0xd8   :  { %820 = vperm.xlu0 %1494, %v1724_v32  }
  0xd9   :  { %v1923_v34 = vpop.permute.xlu1 %308  ;;  %v1925_v54 = vpop.permute.xlu0 %312 }
  0xdb   :  { %1462 = vset.pattern.permute.xlu1 %v2474_v38 }
  0xdc   :  { %712 = vperm.xlu1 %1462, %v1712_v30   ;;  %816 = vperm.xlu0 %1494, %v1729_v33  }
  0xdd   :  { %v1931_v56 = vpop.permute.xlu1 %316  ;;  %v1933_v53 = vpop.permute.xlu0 %320 }
  0xe0   :  { %1463 = vset.pattern.permute.xlu1 %v2476_v14  ;;  %804 = vperm.xlu0 %1494, %v1700_v28  }
  0xe1   :  { %920 = vperm.xlu1 %1463, %v1724_v32  }
  0xe2   :  { %v361_v61 = vpop.permute.xlu1 %360  ;;  %v365_v11 = vpop.permute.xlu0 %364 }
  0xe3   :  { %v427_v41 = vmul.f32 %v1936_v42, %v361_v61  ;;  %v428_v40 = vmul.f32 %v1936_v42, %v365_v11 }
  0xe4   :  { %792 = vperm.xlu0 %1494, %v1693_v27  }
  0xe5   :  { %v443_v60 = vadd.f32 %v427_v41, %v1874_v37  ;;  %v1946_v57 = vadd.f32 %v428_v40, %v1872_v3  ;;  %1464 = vset.pattern.permute.xlu1 %v2472_v46 }
  0xe6   :  { %812 = vperm.xlu1 %1464, %v1712_v30   ;;  %v369_v15 = vpop.permute.xlu1 %368  ;;  %v377_v0 = vpop.permute.xlu0 %376 }
  0xe7   :  { %v429_v39 = vmul.f32 %v1936_v42, %v369_v15  ;;  %v431_v62 = vmul.f32 %v1936_v42, %v377_v0 }
  0xe8   :  { %780 = vperm.xlu0 %1494, %v1664_v22  }
  0xe9   :  { %v1954_v61 = vadd.f32 %v429_v39, %v1886_v5  ;;  %v1956_v11 = vadd.f32 %v431_v62, %v347_v10 }
  0xea   :  { %1465 = vset.pattern.permute.xlu1 %v2476_v14  ;;  %v373_v3 = vpop.permute.xlu1 %372  ;;  %v385_v37 = vpop.permute.xlu0 %384 }
  0xeb   :  { %v430_v41 = vmul.f32 %v1936_v42, %v373_v3  ;;  %v433_v40 = vmul.f32 %v1936_v42, %v385_v37  ;;  %916 = vperm.xlu1 %1465, %v1729_v33  }
  0xec   :  { %768 = vperm.xlu0 %1494, %v1657_v21  }
  0xed   :  { %v446_v15 = vadd.f32 %v430_v41, %v1888_v17  ;;  %v1964_v0 = vadd.f32 %v433_v40, %v349_v44 }
  0xee   :  { %v381_v5 = vpop.permute.xlu1 %380  ;;  %v393_v39 = vpop.permute.xlu0 %392 }
  0xef   :  { %v432_v10 = vmul.f32 %v1936_v42, %v381_v5  ;;  %v435_v62 = vmul.f32 %v1936_v42, %v393_v39  ;;  %1467 = vset.pattern.permute.xlu1 %v2474_v38 }
  0xf0   :  { %704 = vperm.xlu1 %1467, %v1700_v28   ;;  %1497 = vset.pattern.permute.xlu0 %v2474_v38 }
  0xf1   :  { %v448_v3 = vadd.f32 %v432_v10, %v1899_v55  ;;  %v1972_v37 = vadd.f32 %v435_v62, %v351_v43  ;;  %720 = vperm.xlu0 %1497, %v1724_v32   ;;  %v525_v43 = vsub.s32 3, %v1825_v1  ;;  %v2485_v32 = vmov 8  }
  0xf2   :  { %v389_v17 = vpop.permute.xlu1 %388  ;;  %v1975_v44 = vpop.permute.xlu0 %400 }
  0xf3   :  { %v434_v41 = vmul.f32 %v1936_v42, %v389_v17 }
  0xf4   :  { %1468 = vset.pattern.permute.xlu1 %v2472_v46 }
  0xf5   :  { %v450_v40 = vadd.f32 %v434_v41, %v1907_v35  ;;  %808 = vperm.xlu1 %1468, %v1717_v31   ;;  %708 = vperm.xlu0 %1497, %v1717_v31   ;;  %v1995_v35 = vrot.slane %v1837_v6, %v525_v43 }
  0xf6   :  { %v1982_v5 = vpop.permute.xlu1 %396  ;;  %v1984_v55 = vpop.permute.xlu0 %408 }
  0xf7   :  { %2484 = vst [vmem:[#allocation12_spill] sm:$0xff] %v1982_v5 }
  0xf9   :  { %1469 = vset.pattern.permute.xlu1 %v2485_v32  ;;  %696 = vperm.xlu0 %1497, %v1688_v26  }
  0xfa   :  { %1016 = vperm.xlu1 %1469, %v1729_v33   ;;  %v1990_v39 = vpop.permute.xlu1 %404  ;;  %v1992_v10 = vpop.permute.xlu0 %416 }
  0xfb   :  { %2486 = vst [vmem:[#allocation13_spill] sm:$0xff] %v1990_v39 }
  0xfd   :  { %684 = vperm.xlu0 %1497, %v1681_v25  }
  0xfe   :  { %1470 = vset.pattern.permute.xlu1 %v2474_v38  ;;  %v1999_v62 = vpop.permute.xlu1 %412 }
  0xff   :  { %700 = vperm.xlu1 %1470, %v1705_v29   ;;  %v461_v17 = vpop.permute.xlu0 %460 }
 0x100   :  { %v527_v41 = vmul.f32 %v1995_v35, %v461_v17 }
 0x101   :  { %672 = vperm.xlu0 %1497, %v1652_v20  }
 0x102   :  { %v2004_v33 = vadd.f32 %v527_v41, %v443_v60  ;;  %v2006_v46 = vpop.permute.xlu1 %420 }
 0x103   :  { %1471 = vset.pattern.permute.xlu1 %v2476_v14  ;;  %v473_v43 = vpop.permute.xlu0 %472 }
 0x104   :  { %v530_v5 = vmul.f32 %v1995_v35, %v473_v43  ;;  %908 = vperm.xlu1 %1471, %v1717_v31  }
 0x105   :  { %660 = vperm.xlu0 %1497, %v1645_v19  }
 0x106   :  { %v2012_v38 = vadd.f32 %v530_v5, %v446_v15  ;;  %v2487_v5 = vmov 6  }
 0x107   :  { %v465_v45 = vpop.permute.xlu1 %464  ;;  %v481_v59 = vpop.permute.xlu0 %480 }
 0x108   :  { %v528_v17 = vmul.f32 %v1995_v35, %v465_v45  ;;  %v532_v60 = vmul.f32 %v1995_v35, %v481_v59  ;;  %1472 = vset.pattern.permute.xlu1 %v2485_v32 }
 0x109   :  { %1012 = vperm.xlu1 %1472, %v1712_v30   ;;  %1500 = vset.pattern.permute.xlu0 %v2485_v32 }
 0x10a   :  { %v544_v41 = vadd.f32 %v528_v17, %v1946_v57  ;;  %v2020_v43 = vadd.f32 %v532_v60, %v448_v3  ;;  %996 = vperm.xlu0 %1500, %v1688_v26   ;;  %v2489_v60 = vmov 7  }
 0x10b   :  { %v469_v19 = vpop.permute.xlu1 %468  ;;  %v489_v31 = vpop.permute.xlu0 %488 }
 0x10c   :  { %v529_v15 = vmul.f32 %v1995_v35, %v469_v19  ;;  %v534_v45 = vmul.f32 %v1995_v35, %v489_v31 }
 0x10d   :  { %1473 = vset.pattern.permute.xlu1 %v2487_v5 }
 0x10e   :  { %v545_v59 = vadd.f32 %v529_v15, %v1954_v61  ;;  %v2027_v14 = vadd.f32 %v534_v45, %v450_v40  ;;  %800 = vperm.xlu1 %1473, %v1705_v29   ;;  %984 = vperm.xlu0 %1500, %v1681_v25   ;;  %v2491_v15 = vmov 5  }
 0x10f   :  { %v477_v30 = vpop.permute.xlu1 %476  ;;  %v2031_v57 = vpop.permute.xlu0 %496 }
 0x110   :  { %2488 = vst [vmem:[#allocation14_spill] sm:$0xff] %v2031_v57  ;;  %v531_v3 = vmul.f32 %v1995_v35, %v477_v30 }
 0x112   :  { %v547_v17 = vadd.f32 %v531_v3, %v1956_v11  ;;  %1474 = vset.pattern.permute.xlu1 %v2489_v60  ;;  %972 = vperm.xlu0 %1500, %v1652_v20   ;;  %v625_v3 = vsub.s32 4, %v1825_v1 }
 0x113   :  { %904 = vperm.xlu1 %1474, %v1700_v28   ;;  %v485_v61 = vpop.permute.xlu1 %484  ;;  %v2038_v40 = vpop.permute.xlu0 %504 }
 0x114   :  { %2490 = vst [vmem:[#allocation15_spill] sm:$0xff] %v2038_v40  ;;  %v533_v19 = vmul.f32 %v1995_v35, %v485_v61 }
 0x116   :  { %v549_v31 = vadd.f32 %v533_v19, %v1964_v0  ;;  %968 = vperm.xlu0 %1500, %v1657_v21   ;;  %v2056_v0 = vrot.slane %v1837_v6, %v625_v3  ;;  %v2492_v19 = vmov 0   ;;  %v237_v3 = vmul.f32 %v1848_v9, %v1829_v4 }
 0x117   :  { %1476 = vset.pattern.permute.xlu1 %v2491_v15  ;;  %v493_v45 = vpop.permute.xlu1 %492  ;;  %v2044_v30 = vpop.permute.xlu0 %512 }
 0x118   :  { %v535_v11 = vmul.f32 %v1995_v35, %v493_v45  ;;  %692 = vperm.xlu1 %1476, %v1693_v27  }
 0x11a   :  { %v551_v57 = vadd.f32 %v535_v11, %v1972_v37  ;;  %964 = vperm.xlu0 %1500, %v1640_v18  }
 0x11b   :  { %v501_v61 = vpop.permute.xlu1 %500  ;;  %v2051_v63 = vpop.permute.xlu0 %520 }
 0x11c   :  { %1477 = vset.pattern.permute.xlu1 %v2487_v5 }
 0x11d   :  { %796 = vperm.xlu1 %1477, %v1688_v26  }
 0x11e   :  { %1506 = vset.pattern.permute.xlu0 %v2492_v19 }
 0x11f   :  { %v2059_v45 = vpop.permute.xlu1 %508 }
 0x120   :  { %v565_v40 = vpop.permute.xlu0 %564 }
 0x121   :  { %v628_v39 = vmul.f32 %v2056_v0, %v565_v40  ;;  %1478 = vset.pattern.permute.xlu1 %v2485_v32 }
 0x122   :  { %1004 = vperm.xlu1 %1478, %v1700_v28   ;;  %v253_v28 = vadd.f32 %v237_v3, %v1793_v48 }
 0x123   :  { %v2064_v37 = vadd.f32 %v628_v39, %v544_v41  ;;  %v2066_v11 = vpop.permute.xlu1 %516  ;;  %v337_v39 = vmul.f32 %v1861_v16, %v1915_v36  ;;  %v537_v36 = vmul.f32 %v1995_v35, %v501_v61 }
 0x124   :  { %v577_v47 = vpop.permute.xlu0 %576 }
 0x125   :  { %2493 = vst [vmem:[#allocation16_spill] sm:$0xff] %v2064_v37  ;;  %v631_v58 = vmul.f32 %v2056_v0, %v577_v47  ;;  %v437_v47 = vmul.f32 %v1936_v42, %v1975_v44  ;;  %v353_v3 = vadd.f32 %v337_v39, %v253_v28 }
 0x126   :  { %1479 = vset.pattern.permute.xlu1 %v2491_v15 }
 0x127   :  { %v2072_v19 = vadd.f32 %v631_v58, %v547_v17  ;;  %688 = vperm.xlu1 %1479, %v1676_v24  }
 0x128   :  { %v561_v40 = vpop.permute.xlu1 %560  ;;  %v585_v2 = vpop.permute.xlu0 %584 }
 0x129   :  { %2494 = vst [vmem:[#allocation17_spill] sm:$0xff] %v2072_v19  ;;  %v627_v41 = vmul.f32 %v2056_v0, %v561_v40  ;;  %v633_v37 = vmul.f32 %v2056_v0, %v585_v2  ;;  %v453_v19 = vadd.f32 %v437_v47, %v353_v3 }
 0x12b   :  { %v2083_v4 = vadd.f32 %v627_v41, %v2004_v33  ;;  %v2085_v58 = vadd.f32 %v633_v37, %v549_v31  ;;  %1480 = vset.pattern.permute.xlu1 %v2489_v60  ;;  %v553_v41 = vadd.f32 %v537_v36, %v453_v19 }
 0x12c   :  { %896 = vperm.xlu1 %1480, %v1688_v26   ;;  %v569_v48 = vpop.permute.xlu1 %568  ;;  %v593_v17 = vpop.permute.xlu0 %592 }
 0x12d   :  { %2495 = vst [vmem:[#allocation18_spill] sm:$0xff] %v2085_v58  ;;  %v629_v40 = vmul.f32 %v2056_v0, %v569_v48  ;;  %v635_v2 = vmul.f32 %v2056_v0, %v593_v17  ;;  %v241_v58 = vmul.f32 %v1848_v9, %v1854_v13  ;;  %v725_v13 = vsub.s32 5, %v1825_v1 }
 0x12f   :  { %v2092_v44 = vadd.f32 %v629_v40, %v545_v59  ;;  %v2094_v33 = vadd.f32 %v635_v2, %v551_v57 }
 0x130   :  { %1481 = vset.pattern.permute.xlu1 %v2485_v32  ;;  %v573_v31 = vpop.permute.xlu1 %572  ;;  %v601_v37 = vpop.permute.xlu0 %600 }
 0x131   :  { %2496 = vst [vmem:[#allocation19_spill] sm:$0xff] %v2092_v44  ;;  %2497 = vst [vmem:[#allocation20_spill] sm:$0xff] %v2094_v33  ;;  %v630_v26 = vmul.f32 %v2056_v0, %v573_v31  ;;  %v637_v28 = vmul.f32 %v2056_v0, %v601_v37  ;;  %1000 = vperm.xlu1 %1481, %v1705_v29   ;;  %v825_v33 = vsub.s32 6, %v1825_v1 }
 0x133   :  { %v2101_v61 = vadd.f32 %v630_v26, %v2012_v38  ;;  %v2103_v39 = vadd.f32 %v637_v28, %v553_v41 }
 0x134   :  { %v581_v59 = vpop.permute.xlu1 %580  ;;  %v621_v47 = vpop.permute.xlu0 %620 }
 0x135   :  { %v632_v57 = vmul.f32 %v2056_v0, %v581_v59  ;;  %1482 = vset.pattern.permute.xlu1 %v2487_v5 }
 0x136   :  { %788 = vperm.xlu1 %1482, %v1676_v24  }
 0x137   :  { %v2109_v19 = vadd.f32 %v632_v57, %v2020_v43 }
 0x138   :  { %v589_v48 = vpop.permute.xlu1 %588 }
 0x139   :  { %2498 = vst [vmem:[#allocation21_spill] sm:$0xff] %v2109_v19  ;;  %v634_v17 = vmul.f32 %v2056_v0, %v589_v48  ;;  %v2112_v29 = vpop.permute.xlu0 %1020 }
 0x13a   :  { %1483 = vset.pattern.permute.xlu1 %v2489_v60 }
 0x13b   :  { %v2116_v38 = vadd.f32 %v634_v17, %v2027_v14  ;;  %892 = vperm.xlu1 %1483, %v1693_v27  }
 0x13c   :  { %v2119_v3 = vpop.permute.xlu1 %596 }
 0x13d   :  { %2499 = vst [vmem:[#allocation22_spill] sm:$0xff] %v2116_v38  ;;  %2500 = vst [vmem:[#allocation23_spill] sm:$0xff] %v2119_v3  ;;  %v2121_v36 = vpop.permute.xlu0 %1008  ;;  %v442_v38 = vmul.f32 %v1936_v42, %v2006_v46  ;;  %v441_v46 = vmul.f32 %v1936_v42, %v1992_v10 }
 0x13f   :  { %1484 = vset.pattern.permute.xlu1 %v2491_v15 }
 0x140   :  { %680 = vperm.xlu1 %1484, %v1664_v22   ;;  %v2125_v43 = vpop.permute.xlu1 %604 }
 0x142   :  { %v2127_v40 = vpop.permute.xlu0 %912 }
 0x144   :  { %1485 = vset.pattern.permute.xlu1 %v2487_v5  ;;  %v617_v2 = vpop.permute.xlu1 %616 }
 0x145   :  { %784 = vperm.xlu1 %1485, %v1681_v25  }
 0x146   :  { %v2131_v14 = vpop.permute.xlu0 %900 }
 0x148   :  { %v2133_v31 = vpop.permute.xlu1 %612 }
 0x149   :  { %1486 = vset.pattern.permute.xlu1 %v2485_v32 }
 0x14a   :  { %992 = vperm.xlu1 %1486, %v1693_v27   ;;  %v2137_v37 = vpop.permute.xlu0 %888 }
 0x14b   :  { %2501 = vst [vmem:[#allocation24_spill] sm:$0xff] %v2137_v37  ;;  %v341_v37 = vmul.f32 %v1861_v16, %v1931_v56  ;;  %v642_v56 = vmul.f32 %v2056_v0, %v621_v47  ;;  %v641_v47 = vmul.f32 %v2056_v0, %v617_v2 }
 0x14d   :  { %v717_v41 = vpop.permute.xlu1 %716 }
 0x14e   :  { %1487 = vset.pattern.permute.xlu1 %v2491_v15  ;;  %v2140_v26 = vpop.permute.xlu0 %876 }
 0x14f   :  { %2502 = vst [vmem:[#allocation25_spill] sm:$0xff] %v2140_v26  ;;  %676 = vperm.xlu1 %1487, %v1669_v23   ;;  %v242_v26 = vmul.f32 %v1848_v9, %v1852_v12  ;;  %v257_v12 = vadd.f32 %v241_v58, %v1805_v52  ;;  %v925_v58 = vsub.s32 7, %v1825_v1 }
 0x152   :  { %v2143_v28 = vpop.permute.xlu1 %608 }
 0x153   :  { %1488 = vset.pattern.permute.xlu1 %v2489_v60  ;;  %v821_v59 = vpop.permute.xlu0 %820 }
 0x154   :  { %884 = vperm.xlu1 %1488, %v1681_v25  }
 0x157   :  { %v2147_v57 = vpop.permute.xlu1 %712  ;;  %v817_v48 = vpop.permute.xlu0 %816 }
 0x158   :  { %1489 = vset.pattern.permute.xlu1 %v2485_v32 }
 0x159   :  { %988 = vperm.xlu1 %1489, %v1676_v24   ;;  %v342_v24 = vmul.f32 %v1861_v16, %v1933_v53  ;;  %v542_v53 = vmul.f32 %v1995_v35, %v2051_v63  ;;  %v541_v63 = vmul.f32 %v1995_v35, %v2066_v11  ;;  %v2202_v11 = vrot.slane %v1837_v6, %v925_v58 }
 0x15a   :  { %v240_v58 = vmul.f32 %v1848_v9, %v1839_v7 }
 0x15b   :  { %v2151_v27 = vpop.permute.xlu0 %804 }
 0x15c   :  { %2503 = vst [vmem:[#allocation26_spill] sm:$0xff] %v2151_v27  ;;  %v921_v17 = vpop.permute.xlu1 %920 }
 0x15d   :  { %1490 = vset.pattern.permute.xlu1 %v2487_v5 }
 0x15e   :  { %776 = vperm.xlu1 %1490, %v1669_v23   ;;  %v258_v23 = vadd.f32 %v242_v26, %v1803_v51  ;;  %v357_v26 = vadd.f32 %v341_v37, %v257_v12 }
 0x15f   :  { %v2155_v44 = vpop.permute.xlu0 %792 }
 0x160   :  { %v358_v27 = vadd.f32 %v342_v24, %v258_v23  ;;  %v2190_v24 = vrot.slane %v1837_v6, %v725_v13  ;;  %v457_v10 = vadd.f32 %v441_v46, %v357_v26 }
 0x161   :  { %v2159_v25 = vpop.permute.xlu1 %812 }
 0x162   :  { %1491 = vset.pattern.permute.xlu1 %v2489_v60  ;;  %v458_v52 = vadd.f32 %v442_v38, %v358_v27  ;;  %v557_v12 = vadd.f32 %v541_v63, %v457_v10  ;;  %v741_v2 = vmul.f32 %v2190_v24, %v717_v41  ;;  %v942_v63 = vmul.f32 %v2202_v11, %v921_v17 }
 0x163   :  { %880 = vperm.xlu1 %1491, %v1664_v22   ;;  %v2167_v19 = vpop.permute.xlu0 %780 }
 0x164   :  { %2504 = vst [vmem:[#allocation27_spill] sm:$0xff] %v2167_v19  ;;  %v558_v23 = vadd.f32 %v542_v53, %v458_v52  ;;  %v657_v46 = vadd.f32 %v641_v47, %v557_v12  ;;  %v256_v47 = vadd.f32 %v240_v58, %v1797_v49 }
 0x166   :  { %v917_v3 = vpop.permute.xlu1 %916  ;;  %v658_v37 = vadd.f32 %v642_v56, %v558_v23 }
 0x167   :  { %1492 = vset.pattern.permute.xlu1 %v2491_v15  ;;  %v2180_v51 = vpop.permute.xlu0 %768  ;;  %v941_v23 = vmul.f32 %v2202_v11, %v917_v3 }
 0x168   :  { %2505 = vst [vmem:[#allocation28_spill] sm:$0xff] %v2180_v51  ;;  %668 = vperm.xlu1 %1492, %v1657_v21   ;;  %v2193_v51 = vrot.slane %v1837_v6, %v825_v33  ;;  %v239_v21 = vmul.f32 %v1848_v9, %v1841_v8  ;;  %v2210_v8 = vld [vmem:[%s2459_s0 + $0x8] ss:$0 sm:$0xff]  ;;  %v339_v6 = vmul.f32 %v1861_v16, %v1923_v34 }
 0x169   :  { %v1042_v26 = vmul.f32 %v2210_v8, %v2112_v29  ;;  %v757_v34 = vadd.f32 %v741_v2, %v657_v46  ;;  %v539_v29 = vmul.f32 %v1995_v35, %v2059_v45 }
 0x16a   :  { %v842_v27 = vmul.f32 %v2193_v51, %v821_v59  ;;  %v255_v53 = vadd.f32 %v239_v21, %v1799_v50  ;;  %v841_v59 = vmul.f32 %v2193_v51, %v817_v48  ;;  %v439_v50 = vmul.f32 %v1936_v42, %v1984_v55 }
 0x16b   :  { %v2195_v19 = vpop.permute.xlu1 %704  ;;  %v340_v48 = vmul.f32 %v1861_v16, %v1925_v54  ;;  %v440_v55 = vmul.f32 %v1936_v42, %v1999_v62 }
 0x16c   :  { %1493 = vset.pattern.permute.xlu1 %v2487_v5  ;;  %v721_v38 = vpop.permute.xlu0 %720  ;;  %v355_v21 = vadd.f32 %v339_v6, %v255_v53  ;;  %v857_v17 = vadd.f32 %v841_v59, %v757_v34 }
 0x16d   :  { %v742_v33 = vmul.f32 %v2190_v24, %v721_v38  ;;  %772 = vperm.xlu1 %1493, %v1652_v20   ;;  %v356_v45 = vadd.f32 %v340_v48, %v256_v47  ;;  %v940_v48 = vmul.f32 %v2202_v11, %v2127_v40 }
 0x16e   :  { %v957_v54 = vadd.f32 %v941_v23, %v857_v17 }
 0x16f   :  { %v758_v13 = vadd.f32 %v742_v33, %v658_v37  ;;  %v455_v37 = vadd.f32 %v439_v50, %v355_v21  ;;  %v540_v33 = vmul.f32 %v1995_v35, %v2044_v30  ;;  %v456_v53 = vadd.f32 %v440_v55, %v356_v45 }
 0x170   :  { %v809_v52 = vpop.permute.xlu1 %808  ;;  %v709_v56 = vpop.permute.xlu0 %708 }
 0x171   :  { %v858_v41 = vadd.f32 %v842_v27, %v758_v13  ;;  %1495 = vset.pattern.permute.xlu1 %v2485_v32  ;;  %v555_v12 = vadd.f32 %v539_v29, %v455_v37  ;;  %v739_v62 = vmul.f32 %v2190_v24, %v709_v56  ;;  %v556_v30 = vadd.f32 %v540_v33, %v456_v53 }
 0x172   :  { %980 = vperm.xlu1 %1495, %v1664_v22   ;;  %v639_v22 = vmul.f32 %v2056_v0, %v2143_v28  ;;  %v640_v28 = vmul.f32 %v2056_v0, %v2133_v31  ;;  %v840_v31 = vmul.f32 %v2193_v51, %v2159_v25 }
 0x173   :  { %v958_v7 = vadd.f32 %v942_v63, %v858_v41  ;;  %v839_v63 = vmul.f32 %v2193_v51, %v809_v52 }
 0x174   :  { %v2231_v10 = vpop.permute.xlu0 %696  ;;  %v656_v58 = vadd.f32 %v640_v28, %v556_v30  ;;  %v2509_v28 = vld [vmem:[#allocation13_spill] sm:$0xff] }
 0x175   :  { %v1017_v38 = vpop.permute.xlu1 %1016  ;;  %v1058_v3 = vadd.f32 %v1042_v26, %v958_v7 }
 0x176   :  { %v1041_v27 = vmul.f32 %v2210_v8, %v1017_v38  ;;  %1496 = vset.pattern.permute.xlu1 %v2491_v15  ;;  %v655_v15 = vadd.f32 %v639_v22, %v555_v12  ;;  %v1509_v38 = vld [vmem:[%s2460_s1 + $0x8] sm:$0xff]  ;;  %v1510_v12 = vld [vmem:[%s2460_s1 + $0x10] sm:$0xff] }
 0x177   :  { %664 = vperm.xlu1 %1496, %v1640_v18   ;;  %v1074_v49 = vmax.f32 %v1058_v3, 0.0  ;;  %v740_v18 = vmul.f32 %v2190_v24, %v2147_v57 }
 0x178   :  { %v1057_v2 = vadd.f32 %v1041_v27, %v957_v54  ;;  %v2244_v13 = vpop.permute.xlu0 %684  ;;  %v755_v59 = vadd.f32 %v739_v62, %v655_v15  ;;  %v2506_v54 = vld [vmem:[#allocation9_spill] sm:$0xff]  ;;  %v937_v27 = vmul.f32 %v2202_v11, %v2131_v14  ;;  %v2507_v62 = vld [vmem:[#allocation11_spill] sm:$0xff]  ;;  %v438_v15 = vmul.f32 %v1936_v42, %v2509_v28 }
 0x179   :  { %1364 = vmatprep.subr.mxu0 %v1074_v49  ;;  %1408 = vmatprep.subr.mxu1 %v1074_v49  ;;  %v756_v41 = vadd.f32 %v740_v18, %v656_v58  ;;  %v2510_v18 = vld [vmem:[#allocation15_spill] sm:$0xff] }
 0x17a   :  { %v1073_v6 = vmax.f32 %v1057_v2, 0.0  ;;  %v701_v46 = vpop.permute.xlu1 %700  ;;  %1365 = vmatpush3.msra.mxu0 %v1074_v49  ;;  %1424 = vmatpush3.msra.mxu1 %v1074_v49  ;;  %v855_v34 = vadd.f32 %v839_v63, %v755_v59  ;;  %v338_v2 = vmul.f32 %v1861_v16, %v2507_v62  ;;  %v538_v59 = vmul.f32 %v1995_v35, %v2510_v18  ;;  %v1086_v18 = vld [vmem:[%s2463_s4 + $0x18] sm:$0xff] }
 0x17b   :  { %1498 = vset.pattern.permute.xlu1 %v2489_v60  ;;  %v856_v7 = vadd.f32 %v840_v31, %v756_v41  ;;  %v737_v40 = vmul.f32 %v2190_v24, %v701_v46  ;;  %v638_v31 = vmul.f32 %v2056_v0, %v2125_v43  ;;  %v835_v41 = vmul.f32 %v2193_v51, %v2155_v44 }
 0x17c   :  { %872 = vperm.xlu1 %1498, %v1652_v20   ;;  %v673_v56 = vpop.permute.xlu0 %672  ;;  %1366 = vmatprep.subr.mxu0 %v1073_v6  ;;  %v1039_v20 = vmul.f32 %v2210_v8, %v2121_v36  ;;  %v2519_v62 = vmov 0  }
 0x17d   :  { %v730_v26 = vmul.f32 %v2190_v24, %v673_v56  ;;  %1409 = vmatprep.subr.mxu1 %v1073_v6  ;;  %1367 = vmatpush3.msra.mxu0 %v1073_v6  ;;  %v956_v47 = vadd.f32 %v940_v48, %v856_v7  ;;  %v753_v45 = vadd.f32 %v737_v40, %v2103_v39  ;;  %v2508_v39 = vld [vmem:[#allocation7_spill] sm:$0xff]  ;;  %v1511_v56 = vld [vmem:[%s2460_s1] sm:$0xff] }
 0x17e   :  { %1425 = vmatpush3.msra.mxu1 %v1073_v6 }
 0x17f   :  { %v2257_v57 = vadd.f32 %v730_v26, %v2101_v61  ;;  %v909_v50 = vpop.permute.xlu1 %908  ;;  %v1508_v61 = vld [vmem:[%s2460_s1 + $0x20] sm:$0xff] }
 0x180   :  { %v939_v23 = vmul.f32 %v2202_v11, %v909_v50  ;;  %1499 = vset.pattern.permute.xlu1 %v2485_v32  ;;  %v661_v25 = vpop.permute.xlu0 %660 }
 0x181   :  { %v727_v52 = vmul.f32 %v2190_v24, %v661_v25  ;;  %976 = vperm.xlu1 %1499, %v1508_v61   ;;  %v2512_v25 = vld [vmem:[#allocation26_spill] sm:$0xff]  ;;  %v2513_v61 = vld [vmem:[#allocation8_spill] sm:$0xff] }
 0x182   :  { %v955_v21 = vadd.f32 %v939_v23, %v855_v34  ;;  %v2511_v34 = vld [vmem:[#allocation20_spill] sm:$0xff]  ;;  %v838_v48 = vmul.f32 %v2193_v51, %v2512_v25  ;;  %v236_v44 = vmul.f32 %v1848_v9, %v2513_v61 }
 0x183   :  { %v2270_v36 = vadd.f32 %v727_v52, %v2083_v4  ;;  %v238_v4 = vmul.f32 %v1848_v9, %v2506_v54 }
 0x184   :  { %v1055_v29 = vadd.f32 %v1039_v20, %v955_v21  ;;  %v1013_v17 = vpop.permute.xlu1 %1012  ;;  %v2514_v21 = vld [vmem:[#allocation10_spill] sm:$0xff] }
 0x185   :  { %v1040_v55 = vmul.f32 %v2210_v8, %v1013_v17  ;;  %1501 = vset.pattern.permute.xlu1 %v2487_v5  ;;  %v254_v14 = vadd.f32 %v238_v4, %v2508_v39  ;;  %v2515_v17 = vld [vmem:[#allocation6_spill] sm:$0xff] }
 0x186   :  { %764 = vperm.xlu1 %1501, %v1509_v38   ;;  %v1071_v49 = vmax.f32 %v1055_v29, 0.0 }
 0x187   :  { %v1056_v3 = vadd.f32 %v1040_v55, %v956_v47  ;;  %v354_v30 = vadd.f32 %v338_v2, %v254_v14  ;;  %v252_v47 = vadd.f32 %v236_v44, %v2515_v17  ;;  %v2516_v55 = vld [vmem:[#allocation12_spill] sm:$0xff] }
 0x188   :  { %v436_v40 = vmul.f32 %v1936_v42, %v2516_v55  ;;  %v1075_v42 = vld [vmem:[%s2462_s3] sm:$0xff]  ;;  %v1247_v17 = vld [vmem:[%s2464_s5 + $0x18] sm:$0xff]  ;;  %v2522_v55 = vld [vmem:[#allocation27_spill] sm:$0xff] }
 0x189   :  { %v1072_v37 = vmax.f32 %v1056_v3, 0.0  ;;  %v801_v22 = vpop.permute.xlu1 %800  ;;  %v454_v58 = vadd.f32 %v438_v15, %v354_v30  ;;  %1396 = vmatprep.mubr.f32.mxu0 %v1075_v42  ;;  %v997_v15 = vpop.permute.xlu0 %996  ;;  %v1250_v42 = vld [vmem:[%s2464_s5 + $0x30] sm:$0xff] }
 0x18a   :  { %v837_v33 = vmul.f32 %v2193_v51, %v801_v22  ;;  %1502 = vset.pattern.permute.xlu1 %v2489_v60  ;;  %v2517_v22 = vld [vmem:[#allocation14_spill] sm:$0xff] }
 0x18b   :  { %868 = vperm.xlu1 %1502, %v1510_v12   ;;  %1368 = vmatprep.subr.mxu0 %v1072_v37  ;;  %v554_v63 = vadd.f32 %v538_v59, %v454_v58  ;;  %v536_v54 = vmul.f32 %v1995_v35, %v2517_v22  ;;  %v736_v35 = vmul.f32 %v2190_v24, %v2231_v10  ;;  %v1083_v10 = vld [vmem:[%s2463_s4] sm:$0xff] }
 0x18c   :  { %v853_v53 = vadd.f32 %v837_v33, %v753_v45  ;;  %1410 = vmatprep.subr.mxu1 %v1072_v37  ;;  %1369 = vmatpush3.msra.mxu0 %v1072_v37 }
 0x18d   :  { %1426 = vmatpush3.msra.mxu1 %v1072_v37  ;;  %1370 = vmatprep.subr.mxu0 %v1071_v49  ;;  %v654_v20 = vadd.f32 %v638_v31, %v554_v63  ;;  %v1244_v31 = vld [vmem:[%s2464_s5] sm:$0xff]  ;;  %v1245_v63 = vld [vmem:[%s2464_s5 + $0x8] sm:$0xff] }
 0x18e   :  { %1411 = vmatprep.subr.mxu1 %v1071_v49  ;;  %v905_v6 = vpop.permute.xlu1 %904  ;;  %1371 = vmatpush3.msra.mxu0 %v1071_v49  ;;  %v2293_v46 = vadd.f32 %v937_v27, %v853_v53  ;;  %v1084_v53 = vld [vmem:[%s2463_s4 + $0x8] sm:$0xff] }
 0x18f   :  { %1427 = vmatpush3.msra.mxu1 %v1071_v49  ;;  %1503 = vset.pattern.permute.xlu1 %v2487_v5  ;;  %v738_v5 = vmul.f32 %v2190_v24, %v2195_v19  ;;  %v938_v19 = vmul.f32 %v2202_v11, %v905_v6  ;;  %v1085_v6 = vld [vmem:[%s2463_s4 + $0x10] sm:$0xff] }
 0x190   :  { %760 = vperm.xlu1 %1503, %v1511_v56   ;;  %1093 = vperm.xlu0 %1506, %v1083_v10  }
 0x191   :  { %v754_v43 = vadd.f32 %v738_v5, %v654_v20 }
 0x193   :  { %v693_v26 = vpop.permute.xlu1 %692  ;;  %v854_v29 = vadd.f32 %v838_v48, %v754_v43  ;;  %v2521_v48 = vld [vmem:[#allocation22_spill] sm:$0xff] }
 0x194   :  { %v735_v50 = vmul.f32 %v2190_v24, %v693_v26  ;;  %1504 = vset.pattern.permute.xlu1 %v2489_v60  ;;  %v336_v60 = vmul.f32 %v1861_v16, %v2514_v21  ;;  %v2518_v16 = vld [vmem:[#allocation23_spill] sm:$0xff]  ;;  %1108 = vperm.xlu0 %1506, %v1086_v18  }
 0x195   :  { %864 = vperm.xlu1 %1504, %v1509_v38   ;;  %v954_v3 = vadd.f32 %v938_v19, %v854_v29  ;;  %v636_v45 = vmul.f32 %v2056_v0, %v2518_v16  ;;  %v1246_v19 = vld [vmem:[%s2464_s5 + $0x10] sm:$0xff]  ;;  %v1088_v29 = vld [vmem:[%s2463_s4 + $0x28] sm:$0xff] }
 0x196   :  { %v751_v23 = vadd.f32 %v735_v50, %v2511_v34  ;;  %v352_v9 = vadd.f32 %v336_v60, %v252_v47  ;;  %v1249_v16 = vld [vmem:[%s2464_s5 + $0x28] sm:$0xff] }
 0x198   :  { %v797_v7 = vpop.permute.xlu1 %796  ;;  %v2312_v52 = vadd.f32 %v835_v41, %v751_v23  ;;  %v452_v27 = vadd.f32 %v436_v40, %v352_v9  ;;  %1259 = vperm.xlu0 %1506, %v1245_v63   ;;  %v2520_v23 = vld [vmem:[#allocation24_spill] sm:$0xff]  ;;  %v832_v40 = vmul.f32 %v2193_v51, %v2522_v55  ;;  %v2523_v9 = vld [vmem:[#allocation21_spill] sm:$0xff] }
 0x199   :  { %860 = vperm.xlu1 %1504, %v1511_v56   ;;  %v836_v2 = vmul.f32 %v2193_v51, %v797_v7  ;;  %v934_v25 = vmul.f32 %v2202_v11, %v2520_v23 }
 0x19a   :  { %v552_v12 = vadd.f32 %v536_v54, %v452_v27  ;;  %v1090_v27 = vld [vmem:[%s2463_s4 + $0x38] sm:$0xff] }
 0x19c   :  { %v652_v0 = vadd.f32 %v636_v45, %v552_v12  ;;  %1264 = vperm.xlu0 %1506, %v1246_v19   ;;  %v2528_v19 = vld [vmem:[#allocation19_spill] sm:$0xff] }
 0x19d   :  { %1505 = vset.pattern.permute.xlu1 %v2485_v32  ;;  %v1005_v38 = vpop.permute.xlu1 %1004  ;;  %v1079_v32 = vld [vmem:[%s2462_s3 + $0x20] sm:$0xff] }
 0x19e   :  { %v1038_v37 = vmul.f32 %v2210_v8, %v1005_v38  ;;  %960 = vperm.xlu1 %1505, %v1511_v56   ;;  %1402 = vmatprep.mubr.f32.mxu1 %v1079_v32  ;;  %v752_v39 = vadd.f32 %v736_v35, %v652_v0  ;;  %v1036_v56 = vmul.f32 %v2210_v8, %v997_v15  ;;  %v1251_v32 = vld [vmem:[%s2464_s5 + $0x38] sm:$0xff]  ;;  %v985_v15 = vpop.permute.xlu0 %984 }
 0x19f   :  { %v1033_v18 = vmul.f32 %v2210_v8, %v985_v15 }
 0x1a0   :  { %v1054_v4 = vadd.f32 %v1038_v37, %v954_v3  ;;  %v852_v30 = vadd.f32 %v836_v2, %v752_v39  ;;  %1269 = vperm.xlu0 %1506, %v1247_v17   ;;  %v1089_v3 = vld [vmem:[%s2463_s4 + $0x30] sm:$0xff]  ;;  %v1248_v37 = vld [vmem:[%s2464_s5 + $0x20] sm:$0xff] }
 0x1a2   :  { %v1070_v33 = vmax.f32 %v1054_v4, 0.0  ;;  %v689_v49 = vpop.permute.xlu1 %688  ;;  %1507 = vset.pattern.permute.xlu1 %v2519_v62  ;;  %v1313_v62 = vld [vmem:[#allocation2] sm:$0x1] }
 0x1a3   :  { %1098 = vperm.xlu1 %1507, %v1084_v53   ;;  %v734_v41 = vmul.f32 %v2190_v24, %v689_v49  ;;  %v733_v53 = vmul.f32 %v2190_v24, %v2244_v13 }
 0x1a4   :  { %1372 = vmatprep.subr.mxu0 %v1070_v33  ;;  %1412 = vmatprep.subr.mxu1 %v1070_v33 }
 0x1a5   :  { %1373 = vmatpush3.msra.mxu0 %v1070_v33  ;;  %1428 = vmatpush3.msra.mxu1 %v1070_v33  ;;  %v750_v43 = vadd.f32 %v734_v41, %v2521_v48  ;;  %v2525_v41 = vld [vmem:[#allocation17_spill] sm:$0xff] }
 0x1a6   :  { %1274 = vperm.xlu0 %1506, %v1248_v37  }
 0x1a7   :  { %v897_v14 = vpop.permute.xlu1 %896  ;;  %1103 = vperm.xlu1 %1507, %v1085_v6  }
 0x1a8   :  { %v936_v28 = vmul.f32 %v2202_v11, %v897_v14  ;;  %v2524_v14 = vld [vmem:[#allocation18_spill] sm:$0xff] }
 0x1aa   :  { %v952_v59 = vadd.f32 %v936_v28, %v852_v30  ;;  %1279 = vperm.xlu0 %1506, %v1249_v16  }
 0x1ab   :  { %1254 = vperm.xlu1 %1507, %v1244_v31  }
 0x1ac   :  { %v1001_v58 = vpop.permute.xlu1 %1000  ;;  %v1052_v5 = vadd.f32 %v1036_v56, %v952_v59 }
 0x1ad   :  { %v1037_v26 = vmul.f32 %v2210_v8, %v1001_v58 }
 0x1ae   :  { %v1068_v61 = vmax.f32 %v1052_v5, 0.0  ;;  %1289 = vperm.xlu0 %1506, %v1251_v32  }
 0x1af   :  { %v1053_v50 = vadd.f32 %v1037_v26, %v2293_v46  ;;  %v1087_v46 = vld [vmem:[%s2463_s4 + $0x20] sm:$0xff] }
 0x1b0   :  { %1113 = vperm.xlu1 %1507, %v1087_v46  }
 0x1b1   :  { %v1069_v20 = vmax.f32 %v1053_v50, 0.0  ;;  %v789_v34 = vpop.permute.xlu1 %788 }
 0x1b2   :  { %v834_v7 = vmul.f32 %v2193_v51, %v789_v34  ;;  %v2526_v34 = vld [vmem:[#allocation25_spill] sm:$0xff] }
 0x1b3   :  { %1374 = vmatprep.subr.mxu0 %v1069_v20  ;;  %1413 = vmatprep.subr.mxu1 %v1069_v20  ;;  %v931_v23 = vmul.f32 %v2202_v11, %v2526_v34 }
 0x1b4   :  { %v850_v44 = vadd.f32 %v834_v7, %v750_v43  ;;  %1375 = vmatpush3.msra.mxu0 %v1069_v20  ;;  %1429 = vmatpush3.msra.mxu1 %v1069_v20 }
 0x1b5   :  { %1376 = vmatprep.subr.mxu0 %v1068_v61  ;;  %1414 = vmatprep.subr.mxu1 %v1068_v61 }
 0x1b6   :  { %v893_v21 = vpop.permute.xlu1 %892  ;;  %1377 = vmatpush3.msra.mxu0 %v1068_v61  ;;  %1430 = vmatpush3.msra.mxu1 %v1068_v61  ;;  %v950_v60 = vadd.f32 %v934_v25, %v850_v44  ;;  %v2527_v44 = vld [vmem:[#allocation28_spill] sm:$0xff] }
 0x1b7   :  { %1118 = vperm.xlu1 %1507, %v1088_v29   ;;  %v935_v45 = vmul.f32 %v2202_v11, %v893_v21  ;;  %v829_v46 = vmul.f32 %v2193_v51, %v2527_v44 }
 0x1b9   :  { %v951_v49 = vadd.f32 %v935_v45, %v2312_v52  ;;  %v749_v52 = vadd.f32 %v733_v53, %v2524_v14 }
 0x1bb   :  { %v681_v47 = vpop.permute.xlu1 %680  ;;  %1123 = vperm.xlu1 %1507, %v1089_v3  }
 0x1bc   :  { %v732_v38 = vmul.f32 %v2190_v24, %v681_v47 }
 0x1be   :  { %v748_v22 = vadd.f32 %v732_v38, %v2523_v9 }
 0x1bf   :  { %1128 = vperm.xlu1 %1507, %v1090_v27   ;;  %v973_v27 = vpop.permute.xlu0 %972 }
 0x1c0   :  { %v785_v54 = vpop.permute.xlu1 %784  ;;  %v848_v4 = vadd.f32 %v832_v40, %v748_v22 }
 0x1c1   :  { %v833_v39 = vmul.f32 %v2193_v51, %v785_v54 }
 0x1c3   :  { %1284 = vperm.xlu1 %1507, %v1250_v42   ;;  %v849_v6 = vadd.f32 %v833_v39, %v749_v52 }
 0x1c5   :  { %v993_v33 = vpop.permute.xlu1 %992 }
 0x1c6   :  { %v1035_v12 = vmul.f32 %v2210_v8, %v993_v33 }
 0x1c7   :  { %1316 = vperm.xlu1 %1507, %v1313_v62  }
 0x1c8   :  { %v1051_v35 = vadd.f32 %v1035_v12, %v951_v49 }
 0x1ca   :  { %v1067_v0 = vmax.f32 %v1051_v35, 0.0  ;;  %v677_v2 = vpop.permute.xlu1 %676 }
 0x1cb   :  { %v731_v56 = vmul.f32 %v2190_v24, %v677_v2 }
 0x1cc   :  { %1378 = vmatprep.subr.mxu0 %v1067_v0  ;;  %1415 = vmatprep.subr.mxu1 %v1067_v0 }
 0x1cd   :  { %1379 = vmatpush3.msra.mxu0 %v1067_v0  ;;  %1431 = vmatpush3.msra.mxu1 %v1067_v0  ;;  %v747_v5 = vadd.f32 %v731_v56, %v2525_v41  ;;  %v969_v0 = vpop.permute.xlu0 %968 }
 0x1cf   :  { %v885_v10 = vpop.permute.xlu1 %884 }
 0x1d0   :  { %v933_v28 = vmul.f32 %v2202_v11, %v885_v10 }
 0x1d2   :  { %v949_v30 = vadd.f32 %v933_v28, %v849_v6  ;;  %v2529_v6 = vld [vmem:[#allocation16_spill] sm:$0xff] }
 0x1d4   :  { %v989_v59 = vpop.permute.xlu1 %988  ;;  %v1049_v58 = vadd.f32 %v1033_v18, %v949_v30  ;;  %v965_v18 = vpop.permute.xlu0 %964 }
 0x1d5   :  { %v1034_v13 = vmul.f32 %v2210_v8, %v989_v59 }
 0x1d6   :  { %v1065_v20 = vmax.f32 %v1049_v58, 0.0  ;;  %v1028_v58 = vmul.f32 %v2210_v8, %v965_v18 }
 0x1d7   :  { %v1050_v31 = vadd.f32 %v1034_v13, %v950_v60 }
 0x1d9   :  { %v1066_v26 = vmax.f32 %v1050_v31, 0.0  ;;  %v777_v63 = vpop.permute.xlu1 %776 }
 0x1da   :  { %v831_v50 = vmul.f32 %v2193_v51, %v777_v63 }
 0x1db   :  { %1380 = vmatprep.subr.mxu0 %v1066_v26  ;;  %1416 = vmatprep.subr.mxu1 %v1066_v26 }
 0x1dc   :  { %v847_v25 = vadd.f32 %v831_v50, %v747_v5  ;;  %1381 = vmatpush3.msra.mxu0 %v1066_v26  ;;  %1432 = vmatpush3.msra.mxu1 %v1066_v26 }
 0x1dd   :  { %1382 = vmatprep.subr.mxu0 %v1065_v20  ;;  %1417 = vmatprep.subr.mxu1 %v1065_v20 }
 0x1de   :  { %v881_v48 = vpop.permute.xlu1 %880  ;;  %1383 = vmatpush3.msra.mxu0 %v1065_v20  ;;  %1433 = vmatpush3.msra.mxu1 %v1065_v20  ;;  %v947_v43 = vadd.f32 %v931_v23, %v847_v25 }
 0x1df   :  { %v932_v17 = vmul.f32 %v2202_v11, %v881_v48 }
 0x1e1   :  { %v948_v55 = vadd.f32 %v932_v17, %v848_v4  ;;  %v1030_v4 = vmul.f32 %v2210_v8, %v973_v27 }
 0x1e3   :  { %v669_v7 = vpop.permute.xlu1 %668 }
 0x1e4   :  { %v729_v61 = vmul.f32 %v2190_v24, %v669_v7  ;;  %v1082_v7 = vld [vmem:[%s2462_s3 + $0x38] sm:$0xff] }
 0x1e6   :  { %v745_v21 = vadd.f32 %v729_v61, %v2528_v19 }
 0x1e8   :  { %v773_v60 = vpop.permute.xlu1 %772  ;;  %v845_v29 = vadd.f32 %v829_v46, %v745_v21 }
 0x1e9   :  { %v830_v9 = vmul.f32 %v2193_v51, %v773_v60 }
 0x1eb   :  { %v846_v16 = vadd.f32 %v830_v9, %v2257_v57  ;;  %v1029_v57 = vmul.f32 %v2210_v8, %v969_v0 }
 0x1ed   :  { %v981_v47 = vpop.permute.xlu1 %980 }
 0x1ee   :  { %v1032_v40 = vmul.f32 %v2210_v8, %v981_v47 }
 0x1f0   :  { %v1048_v38 = vadd.f32 %v1032_v40, %v948_v55 }
 0x1f2   :  { %v1064_v3 = vmax.f32 %v1048_v38, 0.0  ;;  %v665_v37 = vpop.permute.xlu1 %664 }
 0x1f3   :  { %v728_v14 = vmul.f32 %v2190_v24, %v665_v37 }
 0x1f4   :  { %1384 = vmatprep.subr.mxu0 %v1064_v3  ;;  %1418 = vmatprep.subr.mxu1 %v1064_v3 }
 0x1f5   :  { %1385 = vmatpush3.msra.mxu0 %v1064_v3  ;;  %1434 = vmatpush3.msra.mxu1 %v1064_v3  ;;  %v744_v30 = vadd.f32 %v728_v14, %v2529_v6 }
 0x1f7   :  { %v873_v22 = vpop.permute.xlu1 %872 }
 0x1f8   :  { %v930_v54 = vmul.f32 %v2202_v11, %v873_v22 }
 0x1fa   :  { %v946_v45 = vadd.f32 %v930_v54, %v846_v16 }
 0x1fc   :  { %v977_v42 = vpop.permute.xlu1 %976  ;;  %v1046_v33 = vadd.f32 %v1030_v4, %v946_v45 }
 0x1fd   :  { %v1031_v32 = vmul.f32 %v2210_v8, %v977_v42 }
 0x1fe   :  { %v1062_v62 = vmax.f32 %v1046_v33, 0.0 }
 0x1ff   :  { %v1047_v49 = vadd.f32 %v1031_v32, %v947_v43  ;;  %v1078_v43 = vld [vmem:[%s2462_s3 + $0x18] sm:$0xff] }
 0x201   :  { %v1063_v12 = vmax.f32 %v1047_v49, 0.0  ;;  %v765_v35 = vpop.permute.xlu1 %764 }
 0x202   :  { %v828_v28 = vmul.f32 %v2193_v51, %v765_v35 }
 0x203   :  { %1386 = vmatprep.subr.mxu0 %v1063_v12  ;;  %1419 = vmatprep.subr.mxu1 %v1063_v12 }
 0x204   :  { %1387 = vmatpush3.msra.mxu0 %v1063_v12  ;;  %1435 = vmatpush3.msra.mxu1 %v1063_v12  ;;  %v844_v13 = vadd.f32 %v828_v28, %v744_v30 }
 0x205   :  { %1388 = vmatprep.subr.mxu0 %v1062_v62  ;;  %1420 = vmatprep.subr.mxu1 %v1062_v62 }
 0x206   :  { %v869_v2 = vpop.permute.xlu1 %868  ;;  %1389 = vmatpush3.msra.mxu0 %v1062_v62  ;;  %1436 = vmatpush3.msra.mxu1 %v1062_v62 }
 0x207   :  { %v929_v53 = vmul.f32 %v2202_v11, %v869_v2 }
 0x209   :  { %v945_v39 = vadd.f32 %v929_v53, %v845_v29 }
 0x20b   :  { %v1045_v52 = vadd.f32 %v1029_v57, %v945_v39  ;;  %v761_v10 = vpop.permute.xlu1 %760  ;;  %v1094_v44 = vpop.permute.xlu0 %1093 }
 0x20c   :  { %v827_v24 = vmul.f32 %v2193_v51, %v761_v10  ;;  %v1076_v51 = vld [vmem:[%s2462_s3 + $0x8] sm:$0xff] }
 0x20d   :  { %v1061_v15 = vmax.f32 %v1045_v52, 0.0 }
 0x20e   :  { %v843_v50 = vadd.f32 %v827_v24, %v2270_v36  ;;  %v1077_v36 = vld [vmem:[%s2462_s3 + $0x10] sm:$0xff] }
 0x20f   :  { %1390 = vmatprep.subr.mxu0 %v1061_v15  ;;  %1421 = vmatprep.subr.mxu1 %v1061_v15  ;;  %v1109_v19 = vpop.permute.xlu0 %1108 }
 0x210   :  { %v865_v59 = vpop.permute.xlu1 %864  ;;  %1391 = vmatpush3.msra.mxu0 %v1061_v15  ;;  %1437 = vmatpush3.msra.mxu1 %v1061_v15 }
 0x211   :  { %v928_v56 = vmul.f32 %v2202_v11, %v865_v59 }
 0x213   :  { %v944_v31 = vadd.f32 %v928_v56, %v844_v13  ;;  %v1260_v60 = vpop.permute.xlu0 %1259 }
 0x214   :  { %v861_v26 = vpop.permute.xlu1 %860 }
 0x215   :  { %v1044_v63 = vadd.f32 %v1028_v58, %v944_v31  ;;  %v927_v41 = vmul.f32 %v2202_v11, %v861_v26  ;;  %v1080_v11 = vld [vmem:[%s2462_s3 + $0x28] sm:$0xff] }
 0x217   :  { %v1060_v5 = vmax.f32 %v1044_v63, 0.0  ;;  %v943_v34 = vadd.f32 %v927_v41, %v843_v50  ;;  %v1265_v17 = vpop.permute.xlu0 %1264 }
 0x219   :  { %v961_v20 = vpop.permute.xlu1 %960  ;;  %1392 = vmatprep.subr.mxu0 %v1060_v5  ;;  %1422 = vmatprep.subr.mxu1 %v1060_v5 }
 0x21a   :  { %v1027_v23 = vmul.f32 %v2210_v8, %v961_v20  ;;  %1393 = vmatpush3.msra.mxu0 %v1060_v5  ;;  %1438 = vmatpush3.msra.mxu1 %v1060_v5  ;;  %v1081_v8 = vld [vmem:[%s2462_s3 + $0x30] sm:$0xff]  ;;  %s1543_s3 = smov [#allocation3]  }
 0x21b   :  { %v1270_v38 = vpop.permute.xlu0 %1269  ;;  %s1331_s0 = sshll.u32 %s1543_s3, 4  ;;  %s1332_s0 = int_to_ptr.vmem [resolvable:$true] %s1331_s0 }
 0x21c   :  { %v1043_v25 = vadd.f32 %v1027_v23, %v943_v34  ;;  %s1512_s20 = scalar_lea.vmem %s1332_s0, 16  ;;  %s1516_s21 = scalar_lea.vmem %s1332_s0, 32 }
 0x21d   :  { %p1513_p0 = scmp.ne.s32.totalorder %s1332_s0, %s1512_s20  ;;  %p1517_p1 = scmp.lt.s32.totalorder %s1332_s0, %s1332_s0 }
 0x21e   :  { %v1059_v48 = vmax.f32 %v1043_v25, 0.0  ;;  %v1099_v61 = vpop.permute.xlu1 %1098  ;;  %p1518_p2 = scmp.lt.s32.totalorder %s1516_s21, %s1512_s20 }
 0x220   :  { %1394 = vmatprep.subr.mxu0 %v1059_v48  ;;  %1423 = vmatprep.subr.mxu1 %v1059_v48  ;;  %p1519_p3 = por %p1518_p2, %p1517_p1 }
 0x221   :  { %1395 = vmatpush3.msra.mxu0 %v1059_v48  ;;  %1439 = vmatpush3.msra.mxu1 %v1059_v48  ;;  %v1275_v35 = vpop.permute.xlu0 %1274 }
 0x222   :  { %1397 = vmatmul.mubr.f32.vlgmr.msra.gmra.mxu0 %v1076_v51  ;;  %1403 = vmatmul.mubr.f32.vlgmr.msra.gmra.mxu1 %v1080_v11  ;;  %v1104_v46 = vpop.permute.xlu1 %1103  ;;  %p1520_p4 = pnand %p1519_p3, %p1513_p0 }
 0x223   :  { %1399 = vmatprep.mubr.f32.mxu0 %v1077_v36  ;;  %1405 = vmatprep.mubr.f32.mxu1 %v1081_v8 }
 0x225   :  { %v1280_v59 = vpop.permute.xlu0 %1279 }
 0x226   :  { %1400 = vmatmul.mubr.f32.gmra.mxu0 %v1078_v43  ;;  %1406 = vmatmul.mubr.f32.gmra.mxu1 %v1082_v7  ;;  %v1255_v21 = vpop.permute.xlu1 %1254  ;;  %v2530_v43 = vsub.s32 0, %v1825_v1 }
 0x229   :  { %v1290_v50 = vpop.permute.xlu0 %1289 }
 0x22b   :  { %v1114_v29 = vpop.permute.xlu1 %1113 }
 0x232   :  { %v1119_v47 = vpop.permute.xlu1 %1118 }
 0x236   :  { %v1124_v4 = vpop.permute.xlu1 %1123 }
 0x23a   :  { %v1129_v28 = vpop.permute.xlu1 %1128 }
 0x23e   :  { %v1285_v63 = vpop.permute.xlu1 %1284 }
 0x242   :  { %v1317_v36 = vpop.permute.xlu1 %1316 }
 0x243   :  { %v1322_v7 = vrot.slane %v1317_v36, %v2530_v43 }
 0x2e2   :  { %v1398_v55 = vpop.f32.mrf.mxu0  ;;  %v1404_v40 = vpop.f32.mrf.mxu1 }
 0x2e3   :  { %v1203_v3 = vadd.f32 %v1398_v55, %v1099_v61  ;;  %v1223_v2 = vadd.f32 %v1404_v40, %v1119_v47 }
 0x2e4   :  { %v1197_v37 = vpop.f32.mrf.mxu0  ;;  %v1217_v9 = vpop.f32.mrf.mxu1 }
 0x2e5   :  { %v1198_v22 = vadd.f32 %v1197_v37, %v1094_v44  ;;  %v1237_v16 = vmax.f32 %v1203_v3, 0.0  ;;  %v1218_v49 = vadd.f32 %v1217_v9, %v1114_v29  ;;  %v1241_v15 = vmax.f32 %v1223_v2, 0.0 }
 0x2e6   :  { %v1401_v54 = vpop.f32.mrf.mxu0  ;;  %v1407_v27 = vpop.f32.mrf.mxu1 }
 0x2e7   :  { %v1236_v45 = vmax.f32 %v1198_v22, 0.0  ;;  %v1213_v42 = vadd.f32 %v1401_v54, %v1109_v19  ;;  %v1293_v0 = vmul.f32 %v1260_v60, %v1237_v16  ;;  %v1240_v14 = vmax.f32 %v1218_v49, 0.0 }
 0x2e8   :  { %v1207_v32 = vpop.f32.mrf.mxu0  ;;  %v1227_v62 = vpop.f32.mrf.mxu1  ;;  %v1233_v30 = vadd.f32 %v1407_v27, %v1129_v28  ;;  %v1297_v31 = vmul.f32 %v1280_v59, %v1241_v15 }
 0x2e9   :  { %v1292_v33 = vmul.f32 %v1255_v21, %v1236_v45  ;;  %v1208_v12 = vadd.f32 %v1207_v32, %v1104_v46  ;;  %v1239_v57 = vmax.f32 %v1213_v42, 0.0  ;;  %v1228_v10 = vadd.f32 %v1227_v62, %v1124_v4 }
 0x2ea   :  { %v1296_v13 = vmul.f32 %v1275_v35, %v1240_v14  ;;  %v1243_v24 = vmax.f32 %v1233_v30, 0.0 }
 0x2eb   :  { %v1238_v53 = vmax.f32 %v1208_v12, 0.0  ;;  %v1300_v39 = vadd.f32 %v1293_v0, %v1292_v33  ;;  %v1295_v6 = vmul.f32 %v1270_v38, %v1239_v57  ;;  %v1242_v58 = vmax.f32 %v1228_v10, 0.0 }
 0x2ec   :  { %v1299_v20 = vmul.f32 %v1290_v50, %v1243_v24 }
 0x2ed   :  { %v1294_v52 = vmul.f32 %v1265_v17, %v1238_v53  ;;  %v1298_v41 = vmul.f32 %v1285_v63, %v1242_v58 }
 0x2ef   :  { %v1301_v18 = vadd.f32 %v1300_v39, %v1294_v52 }
 0x2f1   :  { %v1302_v56 = vadd.f32 %v1301_v18, %v1295_v6 }
 0x2f3   :  { %v1303_v26 = vadd.f32 %v1302_v56, %v1296_v13 }
 0x2f5   :  { %v1304_v5 = vadd.f32 %v1303_v26, %v1297_v31 }
 0x2f7   :  { %v1305_v34 = vadd.f32 %v1304_v5, %v1298_v41 }
 0x2f9   :  { %v1306_v23 = vadd.f32 %v1305_v34, %v1299_v20 }
 0x2fb   :  { %v1307_v25 = vrot.slane %v1306_v23, 4 }
 0x2fd   :  { %v1308_v48 = vadd.f32 %v1307_v25, %v1306_v23 }
 0x2ff   :  { %v1309_v51 = vrot.slane %v1308_v48, 2 }
 0x301   :  { %v1310_v11 = vadd.f32 %v1309_v51, %v1308_v48 }
 0x303   :  { %v1311_v8 = vrot.slane %v1310_v11, 1 }
 0x305   :  { %v1312_v61 = vadd.f32 %v1311_v8, %v1310_v11 }
 0x307   :  { %v1323_v44 = vadd.f32 %v1322_v7, %v1312_v61 }
 0x309   :  { %1324 = vst [vmem:[#allocation3] sm:$0x1] %v1323_v44 }
 0x30a   :  { %1523 = shalt.err (!%p1520_p4)
}
 0x30b   :  { %1334 = dma.vmem_to_hbm [thread:$0]  %s1332_s0, 16, %s2466_s7, [#allocation4]  }
 0x30c   :  { %1532 = dma.done.wait [#allocation4], 16  }
 0x30d   :  { %1533 = vsyncadd [#allocation4], 4294967280 }
 0x30e   :  { %1338 = vsyncpa [#allocation4], 1 }

</bundles_post_ra>
